<compile_context>
chip_gen: v5e
topology: v5e:2x2
jax: 0.10.0
libtpu: 0.0.40
codegen_flags: <defaults>
</compile_context>

<pallas_src>
import functools

import jax
import jax.numpy as jnp
from jax.experimental import pallas as pl
from jax.experimental.pallas import tpu as pltpu

# ----- small synthetic config (indobert-base-p1 is 12L/768H; scaled down) -----
VOCAB = 100
TYPE_VOCAB = 2
MAX_POS = 16
HIDDEN = 32
N_HEADS = 4
HEAD_DIM = HIDDEN // N_HEADS
INTERMEDIATE = 64
N_LAYERS = 2
LN_EPS = 1e-12
MASK_NEG = -1e30  # large-negative additive mask (avoids -1e4 probability leak)


# --------------------------- in-kernel helpers --------------------------------

def _layer_norm(x, g, b):
    mean = jnp.mean(x, axis=-1, keepdims=True)
    var = jnp.mean(jnp.square(x - mean), axis=-1, keepdims=True)
    return (x - mean) * jax.lax.rsqrt(var + LN_EPS) * g + b


def _gelu(x):
    # TODO(synk): HF BERT uses exact erf-GELU; tanh approximation used here.
    return 0.5 * x * (1.0 + jnp.tanh(0.7978845608028654 * (x + 0.044715 * x * x * x)))


# --------------------------- fused encoder kernel -----------------------------

def _encoder_kernel(x0_ref, mask_ref, embg_ref, embb_ref,
                    wqkv_ref, bqkv_ref, wo_ref, bo_ref, ln1g_ref, ln1b_ref,
                    wi_ref, bi_ref, wo2_ref, bo2_ref, ln2g_ref, ln2b_ref,
                    poolw_ref, poolb_ref,
                    pooled_ref,
                    x_vmem, ctx_vmem,
                    *, batch, seq):
    l = pl.program_id(0)
    scale = 1.0 / (HEAD_DIM ** 0.5)

    # ---- embedding LayerNorm folded into the first grid step -----------------
    @pl.when(l == 0)
    def _():
        x_vmem[...] = _layer_norm(x0_ref[...], embg_ref[...], embb_ref[...])

    x = x_vmem[...]                                    # [B*S, H] f32 carry
    x_bf = x.astype(jnp.bfloat16)

    # ---- fused QKV projection: one [B*S, H] x [H, 3H] matmul -----------------
    qkv = jnp.dot(x_bf, wqkv_ref[0],
                  preferred_element_type=jnp.float32) + bqkv_ref[0]   # [B*S, 3H]
    q = (qkv[:, 0:HIDDEN] * scale).astype(jnp.bfloat16)               # fold scale into q
    k = qkv[:, HIDDEN:2 * HIDDEN].astype(jnp.bfloat16)
    v = qkv[:, 2 * HIDDEN:3 * HIDDEN].astype(jnp.bfloat16)

    # ---- attention: head split/merge done in-kernel, ctx written in ----------
    # ---- merged-head [B*S, H] layout (no HBM transposes) ---------------------
    mask = mask_ref[...]                               # [B, S] additive mask (f32)
    for b in range(batch):                             # static unroll (B*nH tiny dots)
        rows = slice(b * seq, (b + 1) * seq)
        mb = mask[b:b + 1, :]                          # [1, S] -> broadcast over queries
        for h in range(N_HEADS):
            cols = slice(h * HEAD_DIM, (h + 1) * HEAD_DIM)
            qh, kh, vh = q[rows, cols], k[rows, cols], v[rows, cols]
            s = jax.lax.dot_general(                   # q @ k^T  -> [S, S] f32
                qh, kh, (((1,), (1,)), ((), ())),
                preferred_element_type=jnp.float32) + mb
            s = s - jnp.max(s, axis=-1, keepdims=True)
            p = jnp.exp(s)
            p = p * pl.reciprocal(jnp.sum(p, axis=-1, keepdims=True), approx=True)
            ctx_vmem[rows, cols] = jnp.dot(p.astype(jnp.bfloat16), vh,
                                           preferred_element_type=jnp.float32)

    # ---- attention output projection + residual + LayerNorm ------------------
    attn_out = jnp.dot(ctx_vmem[...].astype(jnp.bfloat16), wo_ref[0],
                       preferred_element_type=jnp.float32) + bo_ref[0]
    x = _layer_norm(attn_out + x, ln1g_ref[0], ln1b_ref[0])

    # ---- FFN (gelu) + residual + LayerNorm ------------------------------------
    inter = jnp.dot(x.astype(jnp.bfloat16), wi_ref[0],
                    preferred_element_type=jnp.float32) + bi_ref[0]
    inter = _gelu(inter)
    ff_out = jnp.dot(inter.astype(jnp.bfloat16), wo2_ref[0],
                     preferred_element_type=jnp.float32) + bo2_ref[0]
    x = _layer_norm(ff_out + x, ln2g_ref[0], ln2b_ref[0])
    x_vmem[...] = x

    # ---- pooler fused into the last grid step ---------------------------------
    @pl.when(l == pl.num_programs(0) - 1)
    def _():
        # Tiny: compute tanh-linear over all rows, keep only [CLS] rows (b*seq).
        pooled_all = jnp.tanh(
            jnp.dot(x.astype(jnp.bfloat16), poolw_ref[...],
                    preferred_element_type=jnp.float32) + poolb_ref[...])
        for b in range(batch):
            pooled_ref[b:b + 1, :] = pooled_all[b * seq:b * seq + 1, :]


# --------------------------- model ---------------------------------------------

def init_params(key):
    def dense(k, shape):
        return jax.random.normal(k, shape, jnp.float32) * 0.02

    H, I, L = HIDDEN, INTERMEDIATE, N_LAYERS
    keys = jax.random.split(key, 4 + L)

    wqkv, wo, wi, wo2 = [], [], [], []
    for li in range(L):
        lk = jax.random.split(keys[4 + li], 6)
        wqkv.append(jnp.concatenate(
            [dense(lk[0], (H, H)), dense(lk[1], (H, H)), dense(lk[2], (H, H))], axis=1))
        wo.append(dense(lk[3], (H, H)))
        wi.append(dense(lk[4], (H, I)))
        wo2.append(dense(lk[5], (I, H)))

    return {
        "word_emb": dense(keys[0], (VOCAB, H)),
        "pos_emb": dense(keys[1], (MAX_POS, H)),
        "type_emb": dense(keys[2], (TYPE_VOCAB, H)),
        "emb_ln_g": jnp.ones((H,), jnp.float32),
        "emb_ln_b": jnp.zeros((H,), jnp.float32),
        "pool_w": dense(keys[3], (H, H)),
        "pool_b": jnp.zeros((H,), jnp.float32),
        # per-layer weights stacked on a leading layer axis for the fused kernel
        "wqkv": jnp.stack(wqkv),                        # [L, H, 3H]
        "bqkv": jnp.zeros((L, 1, 3 * H), jnp.float32),
        "wo": jnp.stack(wo),                            # [L, H, H]
        "bo": jnp.zeros((L, 1, H), jnp.float32),
        "ln1_g": jnp.ones((L, 1, H), jnp.float32),
        "ln1_b": jnp.zeros((L, 1, H), jnp.float32),
        "wi": jnp.stack(wi),                            # [L, H, I]
        "bi": jnp.zeros((L, 1, I), jnp.float32),
        "wo2": jnp.stack(wo2),                          # [L, I, H]
        "bo2": jnp.zeros((L, 1, H), jnp.float32),
        "ln2_g": jnp.ones((L, 1, H), jnp.float32),
        "ln2_b": jnp.zeros((L, 1, H), jnp.float32),
    }


def bert_embedding_forward(params, input_ids, attention_mask):
    """Returns pooler_output: tanh(W_pool @ h_CLS + b_pool), shape [B, HIDDEN]."""
    B, S = input_ids.shape
    T = B * S
    H, I, I3 = HIDDEN, INTERMEDIATE, 3 * HIDDEN
    L = params["wqkv"].shape[0]

    # embeddings (gather is glue in plain JAX); token_type_ids default to 0.
    x0 = (params["word_emb"][input_ids]
          + params["pos_emb"][None, :S, :]
          + params["type_emb"][0][None, None, :]).reshape(T, H)

    # additive attention mask [B, S] (0 keep, MASK_NEG pad)
    mask_add = (1.0 - attention_mask.astype(jnp.float32)) * MASK_NEG

    bf16 = jnp.bfloat16
    const2 = lambda shape: pl.BlockSpec(shape, lambda l: (0, 0))
    perlayer = lambda shape: pl.BlockSpec(shape, lambda l: (l, 0, 0))

    grid_spec = pltpu.PrefetchScalarGridSpec(
        num_scalar_prefetch=0,
        grid=(L,),
        in_specs=[
            const2((T, H)),            # x0 (pre-LN embeddings), VMEM-resident
            const2((B, S)),            # additive mask
            const2((1, H)),            # emb LN gamma
            const2((1, H)),            # emb LN beta
            perlayer((1, H, I3)),      # wqkv  (per-layer block)
            perlayer((1, 1, I3)),      # bqkv
            perlayer((1, H, H)),       # wo
            perlayer((1, 1, H)),       # bo
            perlayer((1, 1, H)),       # ln1 gamma
            perlayer((1, 1, H)),       # ln1 beta
            perlayer((1, H, I)),       # wi
            perlayer((1, 1, I)),       # bi
            perlayer((1, I, H)),       # wo2
            perlayer((1, 1, H)),       # bo2
            perlayer((1, 1, H)),       # ln2 gamma
            perlayer((1, 1, H)),       # ln2 beta
            const2((H, H)),            # pool_w
            const2((1, H)),            # pool_b
        ],
        out_specs=pl.BlockSpec((B, H), lambda l: (0, 0)),
        scratch_shapes=[pltpu.VMEM((T, H), jnp.float32),   # hidden-state carry
                        pltpu.VMEM((T, H), jnp.float32)],  # attention context
    )

    pooled = pl.pallas_call(
        functools.partial(_encoder_kernel, batch=B, seq=S),
        grid_spec=grid_spec,
        out_shape=jax.ShapeDtypeStruct((B, H), jnp.float32),
        compiler_params=pltpu.CompilerParams(
            dimension_semantics=("arbitrary",)),   # sequential carry over layers
    )(
        x0, mask_add,
        params["emb_ln_g"].reshape(1, H), params["emb_ln_b"].reshape(1, H),
        params["wqkv"].astype(bf16), params["bqkv"],
        params["wo"].astype(bf16), params["bo"],
        params["ln1_g"], params["ln1_b"],
        params["wi"].astype(bf16), params["bi"],
        params["wo2"].astype(bf16), params["bo2"],
        params["ln2_g"], params["ln2_b"],
        params["pool_w"].astype(bf16), params["pool_b"].reshape(1, H),
    )
    return pooled


if __name__ == "__main__":
    B, S = 2, 8
    key = jax.random.PRNGKey(0)
    k_param, k_ids = jax.random.split(key)

    params = init_params(k_param)
    input_ids = jax.random.randint(k_ids, (B, S), 0, VOCAB, dtype=jnp.int32)
    attention_mask = jnp.array([[1] * S, [1] * (S - 2) + [0, 0]], dtype=jnp.int32)

    fwd = jax.jit(bert_embedding_forward)
    pooled = fwd(params, input_ids, attention_mask)
    jax.block_until_ready(pooled)

    assert pooled.shape == (B, HIDDEN) and pooled.dtype == jnp.float32
    print("KERNEL_OK")
</pallas_src>

<mosaic_0001>
module attributes {stable_mosaic.version = 11 : i64} {
  func.func @_encoder_kernel(%arg0: i32, %arg1: memref<16x32xf32, #tpu.memory_space<vmem>>, %arg2: memref<2x8xf32, #tpu.memory_space<vmem>>, %arg3: memref<1x32xf32, #tpu.memory_space<vmem>>, %arg4: memref<1x32xf32, #tpu.memory_space<vmem>>, %arg5: memref<1x32x96xbf16, #tpu.memory_space<vmem>>, %arg6: memref<1x1x96xf32, #tpu.memory_space<vmem>>, %arg7: memref<1x32x32xbf16, #tpu.memory_space<vmem>>, %arg8: memref<1x1x32xf32, #tpu.memory_space<vmem>>, %arg9: memref<1x1x32xf32, #tpu.memory_space<vmem>>, %arg10: memref<1x1x32xf32, #tpu.memory_space<vmem>>, %arg11: memref<1x32x64xbf16, #tpu.memory_space<vmem>>, %arg12: memref<1x1x64xf32, #tpu.memory_space<vmem>>, %arg13: memref<1x64x32xbf16, #tpu.memory_space<vmem>>, %arg14: memref<1x1x32xf32, #tpu.memory_space<vmem>>, %arg15: memref<1x1x32xf32, #tpu.memory_space<vmem>>, %arg16: memref<1x1x32xf32, #tpu.memory_space<vmem>>, %arg17: memref<32x32xbf16, #tpu.memory_space<vmem>>, %arg18: memref<1x32xf32, #tpu.memory_space<vmem>>, %arg19: memref<2x32xf32, #tpu.memory_space<vmem>>, %arg20: memref<16x32xf32, #tpu.memory_space<vmem>>, %arg21: memref<16x32xf32, #tpu.memory_space<vmem>>) attributes {dimension_semantics = [#tpu.dimension_semantics<arbitrary>], iteration_bounds = array<i64: 2>, scalar_prefetch = 0 : i64, scratch_operands = 2 : i64, tpu.core_type = #tpu.core_type<tc>, window_params = [{pipeline_mode = #tpu.pipeline_mode<synchronous>, transform_indices = @transform_0, window_bounds = array<i64: 16, 32>}, {pipeline_mode = #tpu.pipeline_mode<synchronous>, transform_indices = @transform_1, window_bounds = array<i64: 2, 8>}, {pipeline_mode = #tpu.pipeline_mode<synchronous>, transform_indices = @transform_2, window_bounds = array<i64: 1, 32>}, {pipeline_mode = #tpu.pipeline_mode<synchronous>, transform_indices = @transform_3, window_bounds = array<i64: 1, 32>}, {transform_indices = @transform_4, window_bounds = array<i64: 1, 32, 96>}, {transform_indices = @transform_5, window_bounds = array<i64: 1, 1, 96>}, {transform_indices = @transform_6, window_bounds = array<i64: 1, 32, 32>}, {transform_indices = @transform_7, window_bounds = array<i64: 1, 1, 32>}, {transform_indices = @transform_8, window_bounds = array<i64: 1, 1, 32>}, {transform_indices = @transform_9, window_bounds = array<i64: 1, 1, 32>}, {transform_indices = @transform_10, window_bounds = array<i64: 1, 32, 64>}, {transform_indices = @transform_11, window_bounds = array<i64: 1, 1, 64>}, {transform_indices = @transform_12, window_bounds = array<i64: 1, 64, 32>}, {transform_indices = @transform_13, window_bounds = array<i64: 1, 1, 32>}, {transform_indices = @transform_14, window_bounds = array<i64: 1, 1, 32>}, {transform_indices = @transform_15, window_bounds = array<i64: 1, 1, 32>}, {pipeline_mode = #tpu.pipeline_mode<synchronous>, transform_indices = @transform_16, window_bounds = array<i64: 32, 32>}, {pipeline_mode = #tpu.pipeline_mode<synchronous>, transform_indices = @transform_17, window_bounds = array<i64: 1, 32>}, {pipeline_mode = #tpu.pipeline_mode<synchronous>, transform_indices = @transform_18, window_bounds = array<i64: 2, 32>}]} {
    %c0_i32 = arith.constant 0 : i32
    %0 = arith.cmpi eq, %arg0, %c0_i32 : i32
    %1 = arith.extui %0 : i1 to i32
    %c0_i32_0 = arith.constant 0 : i32
    %2 = arith.cmpi ne, %1, %c0_i32_0 : i32
    scf.if %2 {
      %c0_108 = arith.constant 0 : index
      %c0_109 = arith.constant 0 : index
      %271 = vector.load %arg1[%c0_108, %c0_109] : memref<16x32xf32, #tpu.memory_space<vmem>>, vector<16x32xf32>
      %c0_110 = arith.constant 0 : index
      %c0_111 = arith.constant 0 : index
      %272 = vector.load %arg3[%c0_110, %c0_111] : memref<1x32xf32, #tpu.memory_space<vmem>>, vector<1x32xf32>
      %c0_112 = arith.constant 0 : index
      %c0_113 = arith.constant 0 : index
      %273 = vector.load %arg4[%c0_112, %c0_113] : memref<1x32xf32, #tpu.memory_space<vmem>>, vector<1x32xf32>
      %cst_114 = arith.constant dense<0.000000e+00> : vector<16xf32>
      %274 = vector.multi_reduction <add>, %271, %cst_114 [1] : vector<16x32xf32> to vector<16xf32>
      %275 = vector.shape_cast %274 : vector<16xf32> to vector<16x1xf32>
      %cst_115 = arith.constant 3.200000e+01 : f32
      %276 = vector.broadcast %cst_115 : f32 to vector<16x1xf32>
      %277 = arith.divf %275, %276 : vector<16x1xf32>
      %278 = vector.broadcast %277 : vector<16x1xf32> to vector<16x32xf32>
      %279 = arith.subf %271, %278 : vector<16x32xf32>
      %280 = arith.mulf %279, %279 : vector<16x32xf32>
      %cst_116 = arith.constant dense<0.000000e+00> : vector<16xf32>
      %281 = vector.multi_reduction <add>, %280, %cst_116 [1] : vector<16x32xf32> to vector<16xf32>
      %282 = vector.shape_cast %281 : vector<16xf32> to vector<16x1xf32>
      %cst_117 = arith.constant 3.200000e+01 : f32
      %283 = vector.broadcast %cst_117 : f32 to vector<16x1xf32>
      %284 = arith.divf %282, %283 : vector<16x1xf32>
      %285 = vector.broadcast %277 : vector<16x1xf32> to vector<16x32xf32>
      %286 = arith.subf %271, %285 : vector<16x32xf32>
      %cst_118 = arith.constant 9.99999996E-13 : f32
      %287 = vector.broadcast %cst_118 : f32 to vector<16x1xf32>
      %288 = arith.addf %284, %287 : vector<16x1xf32>
      %289 = math.rsqrt %288 : vector<16x1xf32>
      %290 = vector.broadcast %289 : vector<16x1xf32> to vector<16x32xf32>
      %291 = arith.mulf %286, %290 : vector<16x32xf32>
      %292 = vector.broadcast %272 : vector<1x32xf32> to vector<16x32xf32>
      %293 = arith.mulf %291, %292 : vector<16x32xf32>
      %294 = vector.broadcast %273 : vector<1x32xf32> to vector<16x32xf32>
      %295 = arith.addf %293, %294 : vector<16x32xf32>
      %c0_119 = arith.constant 0 : index
      %c0_120 = arith.constant 0 : index
      %296 = vector.load %arg20[%c0_119, %c0_120] : memref<16x32xf32, #tpu.memory_space<vmem>>, vector<16x32xf32>
      tpu.vector_store %arg20[%c0_119, %c0_120], %295 {strides = array<i32>} : memref<16x32xf32, #tpu.memory_space<vmem>>, vector<16x32xf32>,
    } else {
    }
    %c0 = arith.constant 0 : index
    %c0_1 = arith.constant 0 : index
    %3 = vector.load %arg20[%c0, %c0_1] : memref<16x32xf32, #tpu.memory_space<vmem>>, vector<16x32xf32>
    %4 = arith.truncf %3 : vector<16x32xf32> to vector<16x32xbf16>
    %c0_2 = arith.constant 0 : index
    %c0_3 = arith.constant 0 : index
    %c0_4 = arith.constant 0 : index
    %5 = vector.load %arg5[%c0_2, %c0_3, %c0_4] : memref<1x32x96xbf16, #tpu.memory_space<vmem>>, vector<1x32x96xbf16>
    %6 = vector.shape_cast %5 : vector<1x32x96xbf16> to vector<32x96xbf16>
    %cst = arith.constant dense<0.000000e+00> : vector<16x96xf32>
    %7 = tpu.matmul %4, %6, %cst {dimension_numbers = #tpu.dot_dimension_numbers<[1], [0], [0], [1], [0, 0, 1, 1], [], []>} : vector<16x32xbf16>, vector<32x96xbf16>, vector<16x96xf32> -> vector<16x96xf32>
    %c0_5 = arith.constant 0 : index
    %c0_6 = arith.constant 0 : index
    %c0_7 = arith.constant 0 : index
    %8 = vector.load %arg6[%c0_5, %c0_6, %c0_7] : memref<1x1x96xf32, #tpu.memory_space<vmem>>, vector<1x1x96xf32>
    %9 = vector.shape_cast %8 : vector<1x1x96xf32> to vector<1x96xf32>
    %10 = vector.broadcast %9 : vector<1x96xf32> to vector<16x96xf32>
    %11 = arith.addf %7, %10 : vector<16x96xf32>
    %12 = vector.extract_strided_slice %11 {offsets = [0, 0], sizes = [16, 32], strides = [1, 1]} : vector<16x96xf32> to vector<16x32xf32>
    %cst_8 = arith.constant 0.353553385 : f32
    %13 = vector.broadcast %cst_8 : f32 to vector<16x32xf32>
    %14 = arith.mulf %12, %13 : vector<16x32xf32>
    %15 = arith.truncf %14 : vector<16x32xf32> to vector<16x32xbf16>
    %16 = vector.extract_strided_slice %11 {offsets = [0, 32], sizes = [16, 32], strides = [1, 1]} : vector<16x96xf32> to vector<16x32xf32>
    %17 = arith.truncf %16 : vector<16x32xf32> to vector<16x32xbf16>
    %18 = vector.extract_strided_slice %11 {offsets = [0, 64], sizes = [16, 32], strides = [1, 1]} : vector<16x96xf32> to vector<16x32xf32>
    %19 = arith.truncf %18 : vector<16x32xf32> to vector<16x32xbf16>
    %c0_9 = arith.constant 0 : index
    %c0_10 = arith.constant 0 : index
    %20 = vector.load %arg2[%c0_9, %c0_10] : memref<2x8xf32, #tpu.memory_space<vmem>>, vector<2x8xf32>
    %21 = vector.extract_strided_slice %20 {offsets = [0, 0], sizes = [1, 8], strides = [1, 1]} : vector<2x8xf32> to vector<1x8xf32>
    %22 = vector.extract_strided_slice %15 {offsets = [0, 0], sizes = [8, 8], strides = [1, 1]} : vector<16x32xbf16> to vector<8x8xbf16>
    %23 = vector.extract_strided_slice %17 {offsets = [0, 0], sizes = [8, 8], strides = [1, 1]} : vector<16x32xbf16> to vector<8x8xbf16>
    %24 = vector.extract_strided_slice %19 {offsets = [0, 0], sizes = [8, 8], strides = [1, 1]} : vector<16x32xbf16> to vector<8x8xbf16>
    %cst_11 = arith.constant dense<0.000000e+00> : vector<8x8xf32>
    %25 = tpu.matmul %22, %23, %cst_11 {dimension_numbers = #tpu.dot_dimension_numbers<[1], [1], [0], [0], [0, 0, 1, 0], [], []>} : vector<8x8xbf16>, vector<8x8xbf16>, vector<8x8xf32> -> vector<8x8xf32>
    %26 = vector.broadcast %21 : vector<1x8xf32> to vector<8x8xf32>
    %27 = arith.addf %25, %26 : vector<8x8xf32>
    %cst_12 = arith.constant dense<0xFF800000> : vector<8xf32>
    %28 = vector.multi_reduction <maximumf>, %27, %cst_12 [1] : vector<8x8xf32> to vector<8xf32>
    %29 = vector.shape_cast %28 : vector<8xf32> to vector<8x1xf32>
    %30 = vector.broadcast %29 : vector<8x1xf32> to vector<8x8xf32>
    %31 = arith.subf %27, %30 : vector<8x8xf32>
    %32 = math.exp %31 : vector<8x8xf32>
    %cst_13 = arith.constant dense<0.000000e+00> : vector<8xf32>
    %33 = vector.multi_reduction <add>, %32, %cst_13 [1] : vector<8x8xf32> to vector<8xf32>
    %34 = vector.shape_cast %33 : vector<8xf32> to vector<8x1xf32>
    %35 = tpu.reciprocal %34 {approx = true} : vector<8x1xf32> -> vector<8x1xf32>
    %36 = vector.broadcast %35 : vector<8x1xf32> to vector<8x8xf32>
    %37 = arith.mulf %32, %36 : vector<8x8xf32>
    %38 = arith.truncf %37 : vector<8x8xf32> to vector<8x8xbf16>
    %cst_14 = arith.constant dense<0.000000e+00> : vector<8x8xf32>
    %39 = tpu.matmul %38, %24, %cst_14 {dimension_numbers = #tpu.dot_dimension_numbers<[1], [0], [0], [1], [0, 0, 1, 1], [], []>} : vector<8x8xbf16>, vector<8x8xbf16>, vector<8x8xf32> -> vector<8x8xf32>
    %c0_15 = arith.constant 0 : index
    %c0_16 = arith.constant 0 : index
    %40 = vector.load %arg21[%c0_15, %c0_16] : memref<16x32xf32, #tpu.memory_space<vmem>>, vector<8x8xf32>
    tpu.vector_store %arg21[%c0_15, %c0_16], %39 {strides = array<i32>} : memref<16x32xf32, #tpu.memory_space<vmem>>, vector<8x8xf32>,
    %41 = vector.extract_strided_slice %15 {offsets = [0, 8], sizes = [8, 8], strides = [1, 1]} : vector<16x32xbf16> to vector<8x8xbf16>
    %42 = vector.extract_strided_slice %17 {offsets = [0, 8], sizes = [8, 8], strides = [1, 1]} : vector<16x32xbf16> to vector<8x8xbf16>
    %43 = vector.extract_strided_slice %19 {offsets = [0, 8], sizes = [8, 8], strides = [1, 1]} : vector<16x32xbf16> to vector<8x8xbf16>
    %cst_17 = arith.constant dense<0.000000e+00> : vector<8x8xf32>
    %44 = tpu.matmul %41, %42, %cst_17 {dimension_numbers = #tpu.dot_dimension_numbers<[1], [1], [0], [0], [0, 0, 1, 0], [], []>} : vector<8x8xbf16>, vector<8x8xbf16>, vector<8x8xf32> -> vector<8x8xf32>
    %45 = vector.broadcast %21 : vector<1x8xf32> to vector<8x8xf32>
    %46 = arith.addf %44, %45 : vector<8x8xf32>
    %cst_18 = arith.constant dense<0xFF800000> : vector<8xf32>
    %47 = vector.multi_reduction <maximumf>, %46, %cst_18 [1] : vector<8x8xf32> to vector<8xf32>
    %48 = vector.shape_cast %47 : vector<8xf32> to vector<8x1xf32>
    %49 = vector.broadcast %48 : vector<8x1xf32> to vector<8x8xf32>
    %50 = arith.subf %46, %49 : vector<8x8xf32>
    %51 = math.exp %50 : vector<8x8xf32>
    %cst_19 = arith.constant dense<0.000000e+00> : vector<8xf32>
    %52 = vector.multi_reduction <add>, %51, %cst_19 [1] : vector<8x8xf32> to vector<8xf32>
    %53 = vector.shape_cast %52 : vector<8xf32> to vector<8x1xf32>
    %54 = tpu.reciprocal %53 {approx = true} : vector<8x1xf32> -> vector<8x1xf32>
    %55 = vector.broadcast %54 : vector<8x1xf32> to vector<8x8xf32>
    %56 = arith.mulf %51, %55 : vector<8x8xf32>
    %57 = arith.truncf %56 : vector<8x8xf32> to vector<8x8xbf16>
    %cst_20 = arith.constant dense<0.000000e+00> : vector<8x8xf32>
    %58 = tpu.matmul %57, %43, %cst_20 {dimension_numbers = #tpu.dot_dimension_numbers<[1], [0], [0], [1], [0, 0, 1, 1], [], []>} : vector<8x8xbf16>, vector<8x8xbf16>, vector<8x8xf32> -> vector<8x8xf32>
    %c0_21 = arith.constant 0 : index
    %c8 = arith.constant 8 : index
    %59 = vector.load %arg21[%c0_21, %c8] : memref<16x32xf32, #tpu.memory_space<vmem>>, vector<8x8xf32>
    tpu.vector_store %arg21[%c0_21, %c8], %58 {strides = array<i32>} : memref<16x32xf32, #tpu.memory_space<vmem>>, vector<8x8xf32>,
    %60 = vector.extract_strided_slice %15 {offsets = [0, 16], sizes = [8, 8], strides = [1, 1]} : vector<16x32xbf16> to vector<8x8xbf16>
    %61 = vector.extract_strided_slice %17 {offsets = [0, 16], sizes = [8, 8], strides = [1, 1]} : vector<16x32xbf16> to vector<8x8xbf16>
    %62 = vector.extract_strided_slice %19 {offsets = [0, 16], sizes = [8, 8], strides = [1, 1]} : vector<16x32xbf16> to vector<8x8xbf16>
    %cst_22 = arith.constant dense<0.000000e+00> : vector<8x8xf32>
    %63 = tpu.matmul %60, %61, %cst_22 {dimension_numbers = #tpu.dot_dimension_numbers<[1], [1], [0], [0], [0, 0, 1, 0], [], []>} : vector<8x8xbf16>, vector<8x8xbf16>, vector<8x8xf32> -> vector<8x8xf32>
    %64 = vector.broadcast %21 : vector<1x8xf32> to vector<8x8xf32>
    %65 = arith.addf %63, %64 : vector<8x8xf32>
    %cst_23 = arith.constant dense<0xFF800000> : vector<8xf32>
    %66 = vector.multi_reduction <maximumf>, %65, %cst_23 [1] : vector<8x8xf32> to vector<8xf32>
    %67 = vector.shape_cast %66 : vector<8xf32> to vector<8x1xf32>
    %68 = vector.broadcast %67 : vector<8x1xf32> to vector<8x8xf32>
    %69 = arith.subf %65, %68 : vector<8x8xf32>
    %70 = math.exp %69 : vector<8x8xf32>
    %cst_24 = arith.constant dense<0.000000e+00> : vector<8xf32>
    %71 = vector.multi_reduction <add>, %70, %cst_24 [1] : vector<8x8xf32> to vector<8xf32>
    %72 = vector.shape_cast %71 : vector<8xf32> to vector<8x1xf32>
    %73 = tpu.reciprocal %72 {approx = true} : vector<8x1xf32> -> vector<8x1xf32>
    %74 = vector.broadcast %73 : vector<8x1xf32> to vector<8x8xf32>
    %75 = arith.mulf %70, %74 : vector<8x8xf32>
    %76 = arith.truncf %75 : vector<8x8xf32> to vector<8x8xbf16>
    %cst_25 = arith.constant dense<0.000000e+00> : vector<8x8xf32>
    %77 = tpu.matmul %76, %62, %cst_25 {dimension_numbers = #tpu.dot_dimension_numbers<[1], [0], [0], [1], [0, 0, 1, 1], [], []>} : vector<8x8xbf16>, vector<8x8xbf16>, vector<8x8xf32> -> vector<8x8xf32>
    %c0_26 = arith.constant 0 : index
    %c16 = arith.constant 16 : index
    %78 = vector.load %arg21[%c0_26, %c16] : memref<16x32xf32, #tpu.memory_space<vmem>>, vector<8x8xf32>
    tpu.vector_store %arg21[%c0_26, %c16], %77 {strides = array<i32>} : memref<16x32xf32, #tpu.memory_space<vmem>>, vector<8x8xf32>,
    %79 = vector.extract_strided_slice %15 {offsets = [0, 24], sizes = [8, 8], strides = [1, 1]} : vector<16x32xbf16> to vector<8x8xbf16>
    %80 = vector.extract_strided_slice %17 {offsets = [0, 24], sizes = [8, 8], strides = [1, 1]} : vector<16x32xbf16> to vector<8x8xbf16>
    %81 = vector.extract_strided_slice %19 {offsets = [0, 24], sizes = [8, 8], strides = [1, 1]} : vector<16x32xbf16> to vector<8x8xbf16>
    %cst_27 = arith.constant dense<0.000000e+00> : vector<8x8xf32>
    %82 = tpu.matmul %79, %80, %cst_27 {dimension_numbers = #tpu.dot_dimension_numbers<[1], [1], [0], [0], [0, 0, 1, 0], [], []>} : vector<8x8xbf16>, vector<8x8xbf16>, vector<8x8xf32> -> vector<8x8xf32>
    %83 = vector.broadcast %21 : vector<1x8xf32> to vector<8x8xf32>
    %84 = arith.addf %82, %83 : vector<8x8xf32>
    %cst_28 = arith.constant dense<0xFF800000> : vector<8xf32>
    %85 = vector.multi_reduction <maximumf>, %84, %cst_28 [1] : vector<8x8xf32> to vector<8xf32>
    %86 = vector.shape_cast %85 : vector<8xf32> to vector<8x1xf32>
    %87 = vector.broadcast %86 : vector<8x1xf32> to vector<8x8xf32>
    %88 = arith.subf %84, %87 : vector<8x8xf32>
    %89 = math.exp %88 : vector<8x8xf32>
    %cst_29 = arith.constant dense<0.000000e+00> : vector<8xf32>
    %90 = vector.multi_reduction <add>, %89, %cst_29 [1] : vector<8x8xf32> to vector<8xf32>
    %91 = vector.shape_cast %90 : vector<8xf32> to vector<8x1xf32>
    %92 = tpu.reciprocal %91 {approx = true} : vector<8x1xf32> -> vector<8x1xf32>
    %93 = vector.broadcast %92 : vector<8x1xf32> to vector<8x8xf32>
    %94 = arith.mulf %89, %93 : vector<8x8xf32>
    %95 = arith.truncf %94 : vector<8x8xf32> to vector<8x8xbf16>
    %cst_30 = arith.constant dense<0.000000e+00> : vector<8x8xf32>
    %96 = tpu.matmul %95, %81, %cst_30 {dimension_numbers = #tpu.dot_dimension_numbers<[1], [0], [0], [1], [0, 0, 1, 1], [], []>} : vector<8x8xbf16>, vector<8x8xbf16>, vector<8x8xf32> -> vector<8x8xf32>
    %c0_31 = arith.constant 0 : index
    %c24 = arith.constant 24 : index
    %97 = vector.load %arg21[%c0_31, %c24] : memref<16x32xf32, #tpu.memory_space<vmem>>, vector<8x8xf32>
    tpu.vector_store %arg21[%c0_31, %c24], %96 {strides = array<i32>} : memref<16x32xf32, #tpu.memory_space<vmem>>, vector<8x8xf32>,
    %98 = vector.extract_strided_slice %20 {offsets = [1, 0], sizes = [1, 8], strides = [1, 1]} : vector<2x8xf32> to vector<1x8xf32>
    %99 = vector.extract_strided_slice %15 {offsets = [8, 0], sizes = [8, 8], strides = [1, 1]} : vector<16x32xbf16> to vector<8x8xbf16>
    %100 = vector.extract_strided_slice %17 {offsets = [8, 0], sizes = [8, 8], strides = [1, 1]} : vector<16x32xbf16> to vector<8x8xbf16>
    %101 = vector.extract_strided_slice %19 {offsets = [8, 0], sizes = [8, 8], strides = [1, 1]} : vector<16x32xbf16> to vector<8x8xbf16>
    %cst_32 = arith.constant dense<0.000000e+00> : vector<8x8xf32>
    %102 = tpu.matmul %99, %100, %cst_32 {dimension_numbers = #tpu.dot_dimension_numbers<[1], [1], [0], [0], [0, 0, 1, 0], [], []>} : vector<8x8xbf16>, vector<8x8xbf16>, vector<8x8xf32> -> vector<8x8xf32>
    %103 = vector.broadcast %98 : vector<1x8xf32> to vector<8x8xf32>
    %104 = arith.addf %102, %103 : vector<8x8xf32>
    %cst_33 = arith.constant dense<0xFF800000> : vector<8xf32>
    %105 = vector.multi_reduction <maximumf>, %104, %cst_33 [1] : vector<8x8xf32> to vector<8xf32>
    %106 = vector.shape_cast %105 : vector<8xf32> to vector<8x1xf32>
    %107 = vector.broadcast %106 : vector<8x1xf32> to vector<8x8xf32>
    %108 = arith.subf %104, %107 : vector<8x8xf32>
    %109 = math.exp %108 : vector<8x8xf32>
    %cst_34 = arith.constant dense<0.000000e+00> : vector<8xf32>
    %110 = vector.multi_reduction <add>, %109, %cst_34 [1] : vector<8x8xf32> to vector<8xf32>
    %111 = vector.shape_cast %110 : vector<8xf32> to vector<8x1xf32>
    %112 = tpu.reciprocal %111 {approx = true} : vector<8x1xf32> -> vector<8x1xf32>
    %113 = vector.broadcast %112 : vector<8x1xf32> to vector<8x8xf32>
    %114 = arith.mulf %109, %113 : vector<8x8xf32>
    %115 = arith.truncf %114 : vector<8x8xf32> to vector<8x8xbf16>
    %cst_35 = arith.constant dense<0.000000e+00> : vector<8x8xf32>
    %116 = tpu.matmul %115, %101, %cst_35 {dimension_numbers = #tpu.dot_dimension_numbers<[1], [0], [0], [1], [0, 0, 1, 1], [], []>} : vector<8x8xbf16>, vector<8x8xbf16>, vector<8x8xf32> -> vector<8x8xf32>
    %c8_36 = arith.constant 8 : index
    %c0_37 = arith.constant 0 : index
    %117 = vector.load %arg21[%c8_36, %c0_37] : memref<16x32xf32, #tpu.memory_space<vmem>>, vector<8x8xf32>
    tpu.vector_store %arg21[%c8_36, %c0_37], %116 {strides = array<i32>} : memref<16x32xf32, #tpu.memory_space<vmem>>, vector<8x8xf32>,
    %118 = vector.extract_strided_slice %15 {offsets = [8, 8], sizes = [8, 8], strides = [1, 1]} : vector<16x32xbf16> to vector<8x8xbf16>
    %119 = vector.extract_strided_slice %17 {offsets = [8, 8], sizes = [8, 8], strides = [1, 1]} : vector<16x32xbf16> to vector<8x8xbf16>
    %120 = vector.extract_strided_slice %19 {offsets = [8, 8], sizes = [8, 8], strides = [1, 1]} : vector<16x32xbf16> to vector<8x8xbf16>
    %cst_38 = arith.constant dense<0.000000e+00> : vector<8x8xf32>
    %121 = tpu.matmul %118, %119, %cst_38 {dimension_numbers = #tpu.dot_dimension_numbers<[1], [1], [0], [0], [0, 0, 1, 0], [], []>} : vector<8x8xbf16>, vector<8x8xbf16>, vector<8x8xf32> -> vector<8x8xf32>
    %122 = vector.broadcast %98 : vector<1x8xf32> to vector<8x8xf32>
    %123 = arith.addf %121, %122 : vector<8x8xf32>
    %cst_39 = arith.constant dense<0xFF800000> : vector<8xf32>
    %124 = vector.multi_reduction <maximumf>, %123, %cst_39 [1] : vector<8x8xf32> to vector<8xf32>
    %125 = vector.shape_cast %124 : vector<8xf32> to vector<8x1xf32>
    %126 = vector.broadcast %125 : vector<8x1xf32> to vector<8x8xf32>
    %127 = arith.subf %123, %126 : vector<8x8xf32>
    %128 = math.exp %127 : vector<8x8xf32>
    %cst_40 = arith.constant dense<0.000000e+00> : vector<8xf32>
    %129 = vector.multi_reduction <add>, %128, %cst_40 [1] : vector<8x8xf32> to vector<8xf32>
    %130 = vector.shape_cast %129 : vector<8xf32> to vector<8x1xf32>
    %131 = tpu.reciprocal %130 {approx = true} : vector<8x1xf32> -> vector<8x1xf32>
    %132 = vector.broadcast %131 : vector<8x1xf32> to vector<8x8xf32>
    %133 = arith.mulf %128, %132 : vector<8x8xf32>
    %134 = arith.truncf %133 : vector<8x8xf32> to vector<8x8xbf16>
    %cst_41 = arith.constant dense<0.000000e+00> : vector<8x8xf32>
    %135 = tpu.matmul %134, %120, %cst_41 {dimension_numbers = #tpu.dot_dimension_numbers<[1], [0], [0], [1], [0, 0, 1, 1], [], []>} : vector<8x8xbf16>, vector<8x8xbf16>, vector<8x8xf32> -> vector<8x8xf32>
    %c8_42 = arith.constant 8 : index
    %c8_43 = arith.constant 8 : index
    %136 = vector.load %arg21[%c8_42, %c8_43] : memref<16x32xf32, #tpu.memory_space<vmem>>, vector<8x8xf32>
    tpu.vector_store %arg21[%c8_42, %c8_43], %135 {strides = array<i32>} : memref<16x32xf32, #tpu.memory_space<vmem>>, vector<8x8xf32>,
    %137 = vector.extract_strided_slice %15 {offsets = [8, 16], sizes = [8, 8], strides = [1, 1]} : vector<16x32xbf16> to vector<8x8xbf16>
    %138 = vector.extract_strided_slice %17 {offsets = [8, 16], sizes = [8, 8], strides = [1, 1]} : vector<16x32xbf16> to vector<8x8xbf16>
    %139 = vector.extract_strided_slice %19 {offsets = [8, 16], sizes = [8, 8], strides = [1, 1]} : vector<16x32xbf16> to vector<8x8xbf16>
    %cst_44 = arith.constant dense<0.000000e+00> : vector<8x8xf32>
    %140 = tpu.matmul %137, %138, %cst_44 {dimension_numbers = #tpu.dot_dimension_numbers<[1], [1], [0], [0], [0, 0, 1, 0], [], []>} : vector<8x8xbf16>, vector<8x8xbf16>, vector<8x8xf32> -> vector<8x8xf32>
    %141 = vector.broadcast %98 : vector<1x8xf32> to vector<8x8xf32>
    %142 = arith.addf %140, %141 : vector<8x8xf32>
    %cst_45 = arith.constant dense<0xFF800000> : vector<8xf32>
    %143 = vector.multi_reduction <maximumf>, %142, %cst_45 [1] : vector<8x8xf32> to vector<8xf32>
    %144 = vector.shape_cast %143 : vector<8xf32> to vector<8x1xf32>
    %145 = vector.broadcast %144 : vector<8x1xf32> to vector<8x8xf32>
    %146 = arith.subf %142, %145 : vector<8x8xf32>
    %147 = math.exp %146 : vector<8x8xf32>
    %cst_46 = arith.constant dense<0.000000e+00> : vector<8xf32>
    %148 = vector.multi_reduction <add>, %147, %cst_46 [1] : vector<8x8xf32> to vector<8xf32>
    %149 = vector.shape_cast %148 : vector<8xf32> to vector<8x1xf32>
    %150 = tpu.reciprocal %149 {approx = true} : vector<8x1xf32> -> vector<8x1xf32>
    %151 = vector.broadcast %150 : vector<8x1xf32> to vector<8x8xf32>
    %152 = arith.mulf %147, %151 : vector<8x8xf32>
    %153 = arith.truncf %152 : vector<8x8xf32> to vector<8x8xbf16>
    %cst_47 = arith.constant dense<0.000000e+00> : vector<8x8xf32>
    %154 = tpu.matmul %153, %139, %cst_47 {dimension_numbers = #tpu.dot_dimension_numbers<[1], [0], [0], [1], [0, 0, 1, 1], [], []>} : vector<8x8xbf16>, vector<8x8xbf16>, vector<8x8xf32> -> vector<8x8xf32>
    %c8_48 = arith.constant 8 : index
    %c16_49 = arith.constant 16 : index
    %155 = vector.load %arg21[%c8_48, %c16_49] : memref<16x32xf32, #tpu.memory_space<vmem>>, vector<8x8xf32>
    tpu.vector_store %arg21[%c8_48, %c16_49], %154 {strides = array<i32>} : memref<16x32xf32, #tpu.memory_space<vmem>>, vector<8x8xf32>,
    %156 = vector.extract_strided_slice %15 {offsets = [8, 24], sizes = [8, 8], strides = [1, 1]} : vector<16x32xbf16> to vector<8x8xbf16>
    %157 = vector.extract_strided_slice %17 {offsets = [8, 24], sizes = [8, 8], strides = [1, 1]} : vector<16x32xbf16> to vector<8x8xbf16>
    %158 = vector.extract_strided_slice %19 {offsets = [8, 24], sizes = [8, 8], strides = [1, 1]} : vector<16x32xbf16> to vector<8x8xbf16>
    %cst_50 = arith.constant dense<0.000000e+00> : vector<8x8xf32>
    %159 = tpu.matmul %156, %157, %cst_50 {dimension_numbers = #tpu.dot_dimension_numbers<[1], [1], [0], [0], [0, 0, 1, 0], [], []>} : vector<8x8xbf16>, vector<8x8xbf16>, vector<8x8xf32> -> vector<8x8xf32>
    %160 = vector.broadcast %98 : vector<1x8xf32> to vector<8x8xf32>
    %161 = arith.addf %159, %160 : vector<8x8xf32>
    %cst_51 = arith.constant dense<0xFF800000> : vector<8xf32>
    %162 = vector.multi_reduction <maximumf>, %161, %cst_51 [1] : vector<8x8xf32> to vector<8xf32>
    %163 = vector.shape_cast %162 : vector<8xf32> to vector<8x1xf32>
    %164 = vector.broadcast %163 : vector<8x1xf32> to vector<8x8xf32>
    %165 = arith.subf %161, %164 : vector<8x8xf32>
    %166 = math.exp %165 : vector<8x8xf32>
    %cst_52 = arith.constant dense<0.000000e+00> : vector<8xf32>
    %167 = vector.multi_reduction <add>, %166, %cst_52 [1] : vector<8x8xf32> to vector<8xf32>
    %168 = vector.shape_cast %167 : vector<8xf32> to vector<8x1xf32>
    %169 = tpu.reciprocal %168 {approx = true} : vector<8x1xf32> -> vector<8x1xf32>
    %170 = vector.broadcast %169 : vector<8x1xf32> to vector<8x8xf32>
    %171 = arith.mulf %166, %170 : vector<8x8xf32>
    %172 = arith.truncf %171 : vector<8x8xf32> to vector<8x8xbf16>
    %cst_53 = arith.constant dense<0.000000e+00> : vector<8x8xf32>
    %173 = tpu.matmul %172, %158, %cst_53 {dimension_numbers = #tpu.dot_dimension_numbers<[1], [0], [0], [1], [0, 0, 1, 1], [], []>} : vector<8x8xbf16>, vector<8x8xbf16>, vector<8x8xf32> -> vector<8x8xf32>
    %c8_54 = arith.constant 8 : index
    %c24_55 = arith.constant 24 : index
    %174 = vector.load %arg21[%c8_54, %c24_55] : memref<16x32xf32, #tpu.memory_space<vmem>>, vector<8x8xf32>
    tpu.vector_store %arg21[%c8_54, %c24_55], %173 {strides = array<i32>} : memref<16x32xf32, #tpu.memory_space<vmem>>, vector<8x8xf32>,
    %c0_56 = arith.constant 0 : index
    %c0_57 = arith.constant 0 : index
    %175 = vector.load %arg21[%c0_56, %c0_57] : memref<16x32xf32, #tpu.memory_space<vmem>>, vector<16x32xf32>
    %176 = arith.truncf %175 : vector<16x32xf32> to vector<16x32xbf16>
    %c0_58 = arith.constant 0 : index
    %c0_59 = arith.constant 0 : index
    %c0_60 = arith.constant 0 : index
    %177 = vector.load %arg7[%c0_58, %c0_59, %c0_60] : memref<1x32x32xbf16, #tpu.memory_space<vmem>>, vector<1x32x32xbf16>
    %178 = vector.shape_cast %177 : vector<1x32x32xbf16> to vector<32x32xbf16>
    %cst_61 = arith.constant dense<0.000000e+00> : vector<16x32xf32>
    %179 = tpu.matmul %176, %178, %cst_61 {dimension_numbers = #tpu.dot_dimension_numbers<[1], [0], [0], [1], [0, 0, 1, 1], [], []>} : vector<16x32xbf16>, vector<32x32xbf16>, vector<16x32xf32> -> vector<16x32xf32>
    %c0_62 = arith.constant 0 : index
    %c0_63 = arith.constant 0 : index
    %c0_64 = arith.constant 0 : index
    %180 = vector.load %arg8[%c0_62, %c0_63, %c0_64] : memref<1x1x32xf32, #tpu.memory_space<vmem>>, vector<1x1x32xf32>
    %181 = vector.shape_cast %180 : vector<1x1x32xf32> to vector<1x32xf32>
    %182 = vector.broadcast %181 : vector<1x32xf32> to vector<16x32xf32>
    %183 = arith.addf %179, %182 : vector<16x32xf32>
    %184 = arith.addf %183, %3 : vector<16x32xf32>
    %c0_65 = arith.constant 0 : index
    %c0_66 = arith.constant 0 : index
    %c0_67 = arith.constant 0 : index
    %185 = vector.load %arg9[%c0_65, %c0_66, %c0_67] : memref<1x1x32xf32, #tpu.memory_space<vmem>>, vector<1x1x32xf32>
    %186 = vector.shape_cast %185 : vector<1x1x32xf32> to vector<1x32xf32>
    %c0_68 = arith.constant 0 : index
    %c0_69 = arith.constant 0 : index
    %c0_70 = arith.constant 0 : index
    %187 = vector.load %arg10[%c0_68, %c0_69, %c0_70] : memref<1x1x32xf32, #tpu.memory_space<vmem>>, vector<1x1x32xf32>
    %188 = vector.shape_cast %187 : vector<1x1x32xf32> to vector<1x32xf32>
    %cst_71 = arith.constant dense<0.000000e+00> : vector<16xf32>
    %189 = vector.multi_reduction <add>, %184, %cst_71 [1] : vector<16x32xf32> to vector<16xf32>
    %190 = vector.shape_cast %189 : vector<16xf32> to vector<16x1xf32>
    %cst_72 = arith.constant 3.200000e+01 : f32
    %191 = vector.broadcast %cst_72 : f32 to vector<16x1xf32>
    %192 = arith.divf %190, %191 : vector<16x1xf32>
    %193 = vector.broadcast %192 : vector<16x1xf32> to vector<16x32xf32>
    %194 = arith.subf %184, %193 : vector<16x32xf32>
    %195 = arith.mulf %194, %194 : vector<16x32xf32>
    %cst_73 = arith.constant dense<0.000000e+00> : vector<16xf32>
    %196 = vector.multi_reduction <add>, %195, %cst_73 [1] : vector<16x32xf32> to vector<16xf32>
    %197 = vector.shape_cast %196 : vector<16xf32> to vector<16x1xf32>
    %cst_74 = arith.constant 3.200000e+01 : f32
    %198 = vector.broadcast %cst_74 : f32 to vector<16x1xf32>
    %199 = arith.divf %197, %198 : vector<16x1xf32>
    %200 = vector.broadcast %192 : vector<16x1xf32> to vector<16x32xf32>
    %201 = arith.subf %184, %200 : vector<16x32xf32>
    %cst_75 = arith.constant 9.99999996E-13 : f32
    %202 = vector.broadcast %cst_75 : f32 to vector<16x1xf32>
    %203 = arith.addf %199, %202 : vector<16x1xf32>
    %204 = math.rsqrt %203 : vector<16x1xf32>
    %205 = vector.broadcast %204 : vector<16x1xf32> to vector<16x32xf32>
    %206 = arith.mulf %201, %205 : vector<16x32xf32>
    %207 = vector.broadcast %186 : vector<1x32xf32> to vector<16x32xf32>
    %208 = arith.mulf %206, %207 : vector<16x32xf32>
    %209 = vector.broadcast %188 : vector<1x32xf32> to vector<16x32xf32>
    %210 = arith.addf %208, %209 : vector<16x32xf32>
    %211 = arith.truncf %210 : vector<16x32xf32> to vector<16x32xbf16>
    %c0_76 = arith.constant 0 : index
    %c0_77 = arith.constant 0 : index
    %c0_78 = arith.constant 0 : index
    %212 = vector.load %arg11[%c0_76, %c0_77, %c0_78] : memref<1x32x64xbf16, #tpu.memory_space<vmem>>, vector<1x32x64xbf16>
    %213 = vector.shape_cast %212 : vector<1x32x64xbf16> to vector<32x64xbf16>
    %cst_79 = arith.constant dense<0.000000e+00> : vector<16x64xf32>
    %214 = tpu.matmul %211, %213, %cst_79 {dimension_numbers = #tpu.dot_dimension_numbers<[1], [0], [0], [1], [0, 0, 1, 1], [], []>} : vector<16x32xbf16>, vector<32x64xbf16>, vector<16x64xf32> -> vector<16x64xf32>
    %c0_80 = arith.constant 0 : index
    %c0_81 = arith.constant 0 : index
    %c0_82 = arith.constant 0 : index
    %215 = vector.load %arg12[%c0_80, %c0_81, %c0_82] : memref<1x1x64xf32, #tpu.memory_space<vmem>>, vector<1x1x64xf32>
    %216 = vector.shape_cast %215 : vector<1x1x64xf32> to vector<1x64xf32>
    %217 = vector.broadcast %216 : vector<1x64xf32> to vector<16x64xf32>
    %218 = arith.addf %214, %217 : vector<16x64xf32>
    %cst_83 = arith.constant 5.000000e-01 : f32
    %219 = vector.broadcast %cst_83 : f32 to vector<16x64xf32>
    %220 = arith.mulf %219, %218 : vector<16x64xf32>
    %cst_84 = arith.constant 4.471500e-02 : f32
    %221 = vector.broadcast %cst_84 : f32 to vector<16x64xf32>
    %222 = arith.mulf %221, %218 : vector<16x64xf32>
    %223 = arith.mulf %222, %218 : vector<16x64xf32>
    %224 = arith.mulf %223, %218 : vector<16x64xf32>
    %225 = arith.addf %218, %224 : vector<16x64xf32>
    %cst_85 = arith.constant 0.797884583 : f32
    %226 = vector.broadcast %cst_85 : f32 to vector<16x64xf32>
    %227 = arith.mulf %226, %225 : vector<16x64xf32>
    %228 = math.tanh %227 : vector<16x64xf32>
    %cst_86 = arith.constant 1.000000e+00 : f32
    %229 = vector.broadcast %cst_86 : f32 to vector<16x64xf32>
    %230 = arith.addf %229, %228 : vector<16x64xf32>
    %231 = arith.mulf %220, %230 : vector<16x64xf32>
    %232 = arith.truncf %231 : vector<16x64xf32> to vector<16x64xbf16>
    %c0_87 = arith.constant 0 : index
    %c0_88 = arith.constant 0 : index
    %c0_89 = arith.constant 0 : index
    %233 = vector.load %arg13[%c0_87, %c0_88, %c0_89] : memref<1x64x32xbf16, #tpu.memory_space<vmem>>, vector<1x64x32xbf16>
    %234 = vector.shape_cast %233 : vector<1x64x32xbf16> to vector<64x32xbf16>
    %cst_90 = arith.constant dense<0.000000e+00> : vector<16x32xf32>
    %235 = tpu.matmul %232, %234, %cst_90 {dimension_numbers = #tpu.dot_dimension_numbers<[1], [0], [0], [1], [0, 0, 1, 1], [], []>} : vector<16x64xbf16>, vector<64x32xbf16>, vector<16x32xf32> -> vector<16x32xf32>
    %c0_91 = arith.constant 0 : index
    %c0_92 = arith.constant 0 : index
    %c0_93 = arith.constant 0 : index
    %236 = vector.load %arg14[%c0_91, %c0_92, %c0_93] : memref<1x1x32xf32, #tpu.memory_space<vmem>>, vector<1x1x32xf32>
    %237 = vector.shape_cast %236 : vector<1x1x32xf32> to vector<1x32xf32>
    %238 = vector.broadcast %237 : vector<1x32xf32> to vector<16x32xf32>
    %239 = arith.addf %235, %238 : vector<16x32xf32>
    %240 = arith.addf %239, %210 : vector<16x32xf32>
    %c0_94 = arith.constant 0 : index
    %c0_95 = arith.constant 0 : index
    %c0_96 = arith.constant 0 : index
    %241 = vector.load %arg15[%c0_94, %c0_95, %c0_96] : memref<1x1x32xf32, #tpu.memory_space<vmem>>, vector<1x1x32xf32>
    %242 = vector.shape_cast %241 : vector<1x1x32xf32> to vector<1x32xf32>
    %c0_97 = arith.constant 0 : index
    %c0_98 = arith.constant 0 : index
    %c0_99 = arith.constant 0 : index
    %243 = vector.load %arg16[%c0_97, %c0_98, %c0_99] : memref<1x1x32xf32, #tpu.memory_space<vmem>>, vector<1x1x32xf32>
    %244 = vector.shape_cast %243 : vector<1x1x32xf32> to vector<1x32xf32>
    %cst_100 = arith.constant dense<0.000000e+00> : vector<16xf32>
    %245 = vector.multi_reduction <add>, %240, %cst_100 [1] : vector<16x32xf32> to vector<16xf32>
    %246 = vector.shape_cast %245 : vector<16xf32> to vector<16x1xf32>
    %cst_101 = arith.constant 3.200000e+01 : f32
    %247 = vector.broadcast %cst_101 : f32 to vector<16x1xf32>
    %248 = arith.divf %246, %247 : vector<16x1xf32>
    %249 = vector.broadcast %248 : vector<16x1xf32> to vector<16x32xf32>
    %250 = arith.subf %240, %249 : vector<16x32xf32>
    %251 = arith.mulf %250, %250 : vector<16x32xf32>
    %cst_102 = arith.constant dense<0.000000e+00> : vector<16xf32>
    %252 = vector.multi_reduction <add>, %251, %cst_102 [1] : vector<16x32xf32> to vector<16xf32>
    %253 = vector.shape_cast %252 : vector<16xf32> to vector<16x1xf32>
    %cst_103 = arith.constant 3.200000e+01 : f32
    %254 = vector.broadcast %cst_103 : f32 to vector<16x1xf32>
    %255 = arith.divf %253, %254 : vector<16x1xf32>
    %256 = vector.broadcast %248 : vector<16x1xf32> to vector<16x32xf32>
    %257 = arith.subf %240, %256 : vector<16x32xf32>
    %cst_104 = arith.constant 9.99999996E-13 : f32
    %258 = vector.broadcast %cst_104 : f32 to vector<16x1xf32>
    %259 = arith.addf %255, %258 : vector<16x1xf32>
    %260 = math.rsqrt %259 : vector<16x1xf32>
    %261 = vector.broadcast %260 : vector<16x1xf32> to vector<16x32xf32>
    %262 = arith.mulf %257, %261 : vector<16x32xf32>
    %263 = vector.broadcast %242 : vector<1x32xf32> to vector<16x32xf32>
    %264 = arith.mulf %262, %263 : vector<16x32xf32>
    %265 = vector.broadcast %244 : vector<1x32xf32> to vector<16x32xf32>
    %266 = arith.addf %264, %265 : vector<16x32xf32>
    %c0_105 = arith.constant 0 : index
    %c0_106 = arith.constant 0 : index
    %267 = vector.load %arg20[%c0_105, %c0_106] : memref<16x32xf32, #tpu.memory_space<vmem>>, vector<16x32xf32>
    tpu.vector_store %arg20[%c0_105, %c0_106], %266 {strides = array<i32>} : memref<16x32xf32, #tpu.memory_space<vmem>>, vector<16x32xf32>,
    %c1_i32 = arith.constant 1 : i32
    %268 = arith.cmpi eq, %arg0, %c1_i32 : i32
    %269 = arith.extui %268 : i1 to i32
    %c0_i32_107 = arith.constant 0 : i32
    %270 = arith.cmpi ne, %269, %c0_i32_107 : i32
    scf.if %270 {
      %271 = arith.truncf %266 : vector<16x32xf32> to vector<16x32xbf16>
      %c0_108 = arith.constant 0 : index
      %c0_109 = arith.constant 0 : index
      %272 = vector.load %arg17[%c0_108, %c0_109] : memref<32x32xbf16, #tpu.memory_space<vmem>>, vector<32x32xbf16>
      %cst_110 = arith.constant dense<0.000000e+00> : vector<16x32xf32>
      %273 = tpu.matmul %271, %272, %cst_110 {dimension_numbers = #tpu.dot_dimension_numbers<[1], [0], [0], [1], [0, 0, 1, 1], [], []>} : vector<16x32xbf16>, vector<32x32xbf16>, vector<16x32xf32> -> vector<16x32xf32>
      %c0_111 = arith.constant 0 : index
      %c0_112 = arith.constant 0 : index
      %274 = vector.load %arg18[%c0_111, %c0_112] : memref<1x32xf32, #tpu.memory_space<vmem>>, vector<1x32xf32>
      %275 = vector.broadcast %274 : vector<1x32xf32> to vector<16x32xf32>
      %276 = arith.addf %273, %275 : vector<16x32xf32>
      %277 = math.tanh %276 : vector<16x32xf32>
      %278 = vector.extract_strided_slice %277 {offsets = [0, 0], sizes = [1, 32], strides = [1, 1]} : vector<16x32xf32> to vector<1x32xf32>
      %c0_113 = arith.constant 0 : index
      %c0_114 = arith.constant 0 : index
      %279 = vector.load %arg19[%c0_113, %c0_114] : memref<2x32xf32, #tpu.memory_space<vmem>>, vector<1x32xf32>
      tpu.vector_store %arg19[%c0_113, %c0_114], %278 {strides = array<i32>} : memref<2x32xf32, #tpu.memory_space<vmem>>, vector<1x32xf32>,
      %280 = vector.extract_strided_slice %277 {offsets = [8, 0], sizes = [1, 32], strides = [1, 1]} : vector<16x32xf32> to vector<1x32xf32>
      %c1 = arith.constant 1 : index
      %c0_115 = arith.constant 0 : index
      %281 = vector.load %arg19[%c1, %c0_115] : memref<2x32xf32, #tpu.memory_space<vmem>>, vector<1x32xf32>
      tpu.vector_store %arg19[%c1, %c0_115], %280 {strides = array<i32>} : memref<2x32xf32, #tpu.memory_space<vmem>>, vector<1x32xf32>,
    } else {
    }
    return
  }
  func.func @transform_0(%arg0: i32) -> (i32, i32) {
    %c0_i32 = arith.constant 0 : i32
    %c0_i32_0 = arith.constant 0 : i32
    %c0_i32_1 = arith.constant 0 : i32
    return %c0_i32, %c0_i32_0 : i32, i32
  }
  func.func @transform_1(%arg0: i32) -> (i32, i32) {
    %c0_i32 = arith.constant 0 : i32
    %c0_i32_0 = arith.constant 0 : i32
    %c0_i32_1 = arith.constant 0 : i32
    return %c0_i32, %c0_i32_0 : i32, i32
  }
  func.func @transform_2(%arg0: i32) -> (i32, i32) {
    %c0_i32 = arith.constant 0 : i32
    %c0_i32_0 = arith.constant 0 : i32
    %c0_i32_1 = arith.constant 0 : i32
    return %c0_i32, %c0_i32_0 : i32, i32
  }
  func.func @transform_3(%arg0: i32) -> (i32, i32) {
    %c0_i32 = arith.constant 0 : i32
    %c0_i32_0 = arith.constant 0 : i32
    %c0_i32_1 = arith.constant 0 : i32
    return %c0_i32, %c0_i32_0 : i32, i32
  }
  func.func @transform_4(%arg0: i32) -> (i32, i32, i32) {
    %c0_i32 = arith.constant 0 : i32
    %c0_i32_0 = arith.constant 0 : i32
    %c0_i32_1 = arith.constant 0 : i32
    return %arg0, %c0_i32, %c0_i32_0 : i32, i32, i32
  }
  func.func @transform_5(%arg0: i32) -> (i32, i32, i32) {
    %c0_i32 = arith.constant 0 : i32
    %c0_i32_0 = arith.constant 0 : i32
    %c0_i32_1 = arith.constant 0 : i32
    return %arg0, %c0_i32, %c0_i32_0 : i32, i32, i32
  }
  func.func @transform_6(%arg0: i32) -> (i32, i32, i32) {
    %c0_i32 = arith.constant 0 : i32
    %c0_i32_0 = arith.constant 0 : i32
    %c0_i32_1 = arith.constant 0 : i32
    return %arg0, %c0_i32, %c0_i32_0 : i32, i32, i32
  }
  func.func @transform_7(%arg0: i32) -> (i32, i32, i32) {
    %c0_i32 = arith.constant 0 : i32
    %c0_i32_0 = arith.constant 0 : i32
    %c0_i32_1 = arith.constant 0 : i32
    return %arg0, %c0_i32, %c0_i32_0 : i32, i32, i32
  }
  func.func @transform_8(%arg0: i32) -> (i32, i32, i32) {
    %c0_i32 = arith.constant 0 : i32
    %c0_i32_0 = arith.constant 0 : i32
    %c0_i32_1 = arith.constant 0 : i32
    return %arg0, %c0_i32, %c0_i32_0 : i32, i32, i32
  }
  func.func @transform_9(%arg0: i32) -> (i32, i32, i32) {
    %c0_i32 = arith.constant 0 : i32
    %c0_i32_0 = arith.constant 0 : i32
    %c0_i32_1 = arith.constant 0 : i32
    return %arg0, %c0_i32, %c0_i32_0 : i32, i32, i32
  }
  func.func @transform_10(%arg0: i32) -> (i32, i32, i32) {
    %c0_i32 = arith.constant 0 : i32
    %c0_i32_0 = arith.constant 0 : i32
    %c0_i32_1 = arith.constant 0 : i32
    return %arg0, %c0_i32, %c0_i32_0 : i32, i32, i32
  }
  func.func @transform_11(%arg0: i32) -> (i32, i32, i32) {
    %c0_i32 = arith.constant 0 : i32
    %c0_i32_0 = arith.constant 0 : i32
    %c0_i32_1 = arith.constant 0 : i32
    return %arg0, %c0_i32, %c0_i32_0 : i32, i32, i32
  }
  func.func @transform_12(%arg0: i32) -> (i32, i32, i32) {
    %c0_i32 = arith.constant 0 : i32
    %c0_i32_0 = arith.constant 0 : i32
    %c0_i32_1 = arith.constant 0 : i32
    return %arg0, %c0_i32, %c0_i32_0 : i32, i32, i32
  }
  func.func @transform_13(%arg0: i32) -> (i32, i32, i32) {
    %c0_i32 = arith.constant 0 : i32
    %c0_i32_0 = arith.constant 0 : i32
    %c0_i32_1 = arith.constant 0 : i32
    return %arg0, %c0_i32, %c0_i32_0 : i32, i32, i32
  }
  func.func @transform_14(%arg0: i32) -> (i32, i32, i32) {
    %c0_i32 = arith.constant 0 : i32
    %c0_i32_0 = arith.constant 0 : i32
    %c0_i32_1 = arith.constant 0 : i32
    return %arg0, %c0_i32, %c0_i32_0 : i32, i32, i32
  }
  func.func @transform_15(%arg0: i32) -> (i32, i32, i32) {
    %c0_i32 = arith.constant 0 : i32
    %c0_i32_0 = arith.constant 0 : i32
    %c0_i32_1 = arith.constant 0 : i32
    return %arg0, %c0_i32, %c0_i32_0 : i32, i32, i32
  }
  func.func @transform_16(%arg0: i32) -> (i32, i32) {
    %c0_i32 = arith.constant 0 : i32
    %c0_i32_0 = arith.constant 0 : i32
    %c0_i32_1 = arith.constant 0 : i32
    return %c0_i32, %c0_i32_0 : i32, i32
  }
  func.func @transform_17(%arg0: i32) -> (i32, i32) {
    %c0_i32 = arith.constant 0 : i32
    %c0_i32_0 = arith.constant 0 : i32
    %c0_i32_1 = arith.constant 0 : i32
    return %c0_i32, %c0_i32_0 : i32, i32
  }
  func.func @transform_18(%arg0: i32) -> (i32, i32) {
    %c0_i32 = arith.constant 0 : i32
    %c0_i32_0 = arith.constant 0 : i32
    %c0_i32_1 = arith.constant 0 : i32
    return %c0_i32, %c0_i32_0 : i32, i32
  }
}

</mosaic_0001>

<bundles_post_ra>
// kernel: bert_embedding_forward.1
= control target key start
LH: loop header
LB: loop body
LE: loop exit
PB: predicated region body
PF: predicated region fallthrough
CT: control target
= control target key end

     0   :  { %s2477_s0 = inlined_call_operand.vmem [shape: f32[16,32], index: 0, kind: input, shape index: {}]   ;;  %s2478_s1 = inlined_call_operand.vmem [shape: f32[2,8], index: 1, kind: input, shape index: {}]   ;;  %s2479_s2 = inlined_call_operand.vmem [shape: f32[1,32], index: 2, kind: input, shape index: {}]   ;;  %s2480_s3 = inlined_call_operand.vmem [shape: f32[1,32], index: 3, kind: input, shape index: {}]   ;;  %s2481_s4 = inlined_call_operand.vmem [shape: bf16[2,32,96], index: 4, kind: input, shape index: {}]   ;;  %s2482_s5 = inlined_call_operand.vmem [shape: f32[2,1,96], index: 5, kind: input, shape index: {}]   ;;  %s2483_s6 = inlined_call_operand.vmem [shape: bf16[2,32,32], index: 6, kind: input, shape index: {}]   ;;  %s2484_s7 = inlined_call_operand.vmem [shape: f32[2,1,32], index: 7, kind: input, shape index: {}]   ;;  %s2485_s8 = inlined_call_operand.vmem [shape: f32[2,1,32], index: 8, kind: input, shape index: {}]   ;;  %s2486_s9 = inlined_call_operand.vmem [shape: f32[2,1,32], index: 9, kind: input, shape index: {}]   ;;  %s2487_s10 = inlined_call_operand.vmem [shape: bf16[2,32,64], index: 10, kind: input, shape index: {}]   ;;  %s2488_s11 = inlined_call_operand.vmem [shape: f32[2,1,64], index: 11, kind: input, shape index: {}]   ;;  %s2489_s12 = inlined_call_operand.vmem [shape: bf16[2,64,32], index: 12, kind: input, shape index: {}]   ;;  %s2490_s13 = inlined_call_operand.vmem [shape: f32[2,1,32], index: 13, kind: input, shape index: {}]   ;;  %s2491_s14 = inlined_call_operand.vmem [shape: f32[2,1,32], index: 14, kind: input, shape index: {}]   ;;  %s2492_s15 = inlined_call_operand.vmem [shape: f32[2,1,32], index: 15, kind: input, shape index: {}]   ;;  %s2493_s16 = inlined_call_operand.vmem [shape: bf16[32,32], index: 16, kind: input, shape index: {}]   ;;  %s2494_s17 = inlined_call_operand.vmem [shape: f32[1,32], index: 17, kind: input, shape index: {}]   ;;  %s2495_s18 = inlined_call_operand.hbm [shape: f32[2,32], index: 18, kind: output, shape index: {}]  }
   0x1   :  { %2500 = sst [smem:[#allocation9_spill]] %s2477_s0 }
   0x2   :  { %2501 = sst [smem:[#allocation10_spill]] %s2478_s1 }
   0x3   :  { %2502 = sst [smem:[#allocation11_spill]] %s2479_s2 }
   0x4   :  { %2503 = sst [smem:[#allocation12_spill]] %s2481_s4 }
   0x5   :  { %2504 = sst [smem:[#allocation13_spill]] %s2483_s6 }
   0x6   :  { %2505 = sst [smem:[#allocation14_spill]] %s2493_s16 }
   0x7   :  { %2506 = sst [smem:[#allocation15_spill]] %s2494_s17 }
   0x8   :  { %2507 = sst [smem:[#allocation16_spill]] %s2495_s18 }
   0x9   :  { %23 = vsyncpa [#allocation5], 0  ;;  %s2182_s27 = smov 0  }
   0xa LB: > { %2508 = sst [smem:[#allocation7_spill]] %s2068_s27  ;;  %s2188_s28 = sadd.s32 4294967295, %s2068_s27   ;;  %s2068_s27 = sphi %s2182_s27, %s29_s27  }
   0xb   : > { %p1832_p0 = scmp.ge.s32.totalorder %s2068_s27, 1  ;;  %p602_p1 = scmp.lt.s32.totalorder %s2068_s27, 3 }
   0xd   : > { %p603_p2 = pnand %p1832_p0, %p602_p1 }
   0xf   : > { %606 = sbr.rel (%p603_p2) target bundleno = 2464 (0x9a0), region = 92 }
  0x14   : > { %p690_p3 = scmp.lt.s32.totalorder %s2188_s28, 1  ;;  %s2509_s4 = sld [smem:[#allocation12_spill]] }
  0x15   : > { %s2510_s6 = sld [smem:[#allocation13_spill]]  ;;  %p1841_p4 = scmp.ne.s32.totalorder %s2188_s28, 0 }
  0x16   : > { %s2194_s29 = scalar_select %p690_p3, %s2188_s28, 1 }
  0x17   : > { %s2512_s25 = sld [smem:[#allocation9_spill]] (!%p1841_p4) }
  0x18   : > { %s1916_s30 = sshll.u32 %s2194_s29, 4  ;;  %s727_s0 = scalar_lea.vmem %s2490_s13, %s2194_s29 }
  0x19   : > { %s730_s20 = scalar_lea.vmem %s2491_s14, %s2194_s29  ;;  %s733_s16 = scalar_lea.vmem %s2492_s15, %s2194_s29 }
  0x1a   : > { %s2204_s22 = scalar_lea.vmem %s2509_s4, %s1916_s30  ;;  %s2226_s4 = scalar_lea.vmem %s2487_s10, %s1916_s30 }
  0x1b   : > { %s2209_s24 = scalar_lea.vmem %s2510_s6, %s1916_s30  ;;  %s719_s6 = scalar_lea.vmem %s2488_s11, %s2194_s29 }
  0x1c   : > { %2511 = sst [smem:[#allocation8_spill]] %s2209_s24  ;;  %s1919_s24 = sshll.u32 %s2194_s29, 5 }
  0x1d   : > { %s2236_s27 = scalar_lea.vmem %s2489_s12, %s1919_s24  ;;  %738 = sbr.rel (%p1841_p4) target bundleno = 312 (0x138), region = 96 }
  0x1e   : > { %s2513_s18 = sld [smem:[#allocation11_spill]] (!%p1841_p4) }
  0x22   : > { %v739_v0 = vld [vmem:[%s2512_s25] sm:$0xff]  ;;  %vm743_vm0 = vcmask 261120   ;;  %v740_v2 = vld [vmem:[%s2512_s25 + $0x8] sm:$0xff]  ;;  %v2070_v4 = vmov 32.0  }
  0x23   : > { %v744_v1 = vsel %vm743_vm0, %v739_v0, 0.0  ;;  %v747_v3 = vsel %vm743_vm0, %v740_v2, 0.0  ;;  %1965 = vrcp.f32 %v2070_v4  ;;  %v1964_v38 = vld [vmem:[%s2480_s3] ss:$0 sm:$0xff] }
  0x24   : > { %745 = vadd.xlane.f32.xlu0 %v744_v1  ;;  %v1963_v35 = vld [vmem:[%s2513_s18] ss:$0 sm:$0xff] }
  0x29   : > { %v1966_v5 = vpop.eup %1965 }
  0x2a   : > { %v751_v6 = vmul.f32 32.0, %v1966_v5  ;;  %vm755_vm1 = vweird.f32 %v1966_v5 }
  0x2c   : > { %748 = vadd.xlane.f32.xlu0 %v747_v3  ;;  %v752_v7 = vsub.f32 1.0, %v751_v6 }
  0x2e   : > { %v753_v8 = vmul.f32 %v1966_v5, %v752_v7 }
  0x30   : > { %v754_v9 = vadd.f32 %v1966_v5, %v753_v8 }
  0x32   : > { %v756_v10 = vsel %vm755_vm1, %v1966_v5, %v754_v9 }
  0x97   : > { %v746_v11 = vpop.xlane.xlu0 %745 }
  0x98   : > { %v757_v12 = vmul.f32 %v756_v10, %v746_v11 }
  0x9a   : > { %v759_v13 = vsub.f32 %v739_v0, %v757_v12 }
  0x9c   : > { %v761_v14 = vmul.f32 %v759_v13, %v759_v13 }
  0x9e   : > { %v763_v15 = vsel %vm743_vm0, %v761_v14, 0.0 }
  0x9f   : > { %764 = vadd.xlane.f32.xlu1 %v763_v15  ;;  %v749_v16 = vpop.xlane.xlu0 %748 }
  0xa0   : > { %v758_v17 = vmul.f32 %v756_v10, %v749_v16 }
  0xa2   : > { %v760_v18 = vsub.f32 %v740_v2, %v758_v17 }
  0xa4   : > { %v762_v19 = vmul.f32 %v760_v18, %v760_v18 }
  0xa6   : > { %v766_v20 = vsel %vm743_vm0, %v762_v19, 0.0 }
  0xa7   : > { %767 = vadd.xlane.f32.xlu1 %v766_v20 }
 0x112   : > { %v765_v21 = vpop.xlane.xlu1 %764 }
 0x113   : > { %v769_v22 = vmul.f32 %v765_v21, %v756_v10 }
 0x115   : > { %v771_v23 = vadd.f32 1e-12, %v769_v22 }
 0x117   : > { %1967 = vrsqrt.f32 %v771_v23  ;;  %vm779_vm3 = vweird.f32 %v771_v23 }
 0x11a   : > { %v768_v24 = vpop.xlane.xlu1 %767 }
 0x11b   : > { %v770_v25 = vmul.f32 %v768_v24, %v756_v10 }
 0x11d   : > { %v1968_v26 = vpop.eup %1967  ;;  %v772_v27 = vadd.f32 1e-12, %v770_v25 }
 0x11e   : > { %v774_v28 = vmul.f32 %v1968_v26, %v771_v23  ;;  %vm780_vm2 = vweird.f32 %v1968_v26 }
 0x11f   : > { %1969 = vrsqrt.f32 %v772_v27  ;;  %vm781_vm4 = vmor %vm779_vm3, %vm780_vm2  ;;  %vm789_vm6 = vweird.f32 %v772_v27 }
 0x120   : > { %v775_v29 = vmul.f32 %v1968_v26, %v774_v28 }
 0x122   : > { %v776_v30 = vmul.f32 0.5, %v775_v29 }
 0x124   : > { %v777_v31 = vsub.f32 1.5, %v776_v30 }
 0x125   : > { %v1970_v32 = vpop.eup %1969 }
 0x126   : > { %v778_v33 = vmul.f32 %v1968_v26, %v777_v31  ;;  %v784_v34 = vmul.f32 %v1970_v32, %v772_v27  ;;  %vm790_vm5 = vweird.f32 %v1970_v32 }
 0x127   : > { %vm791_vm7 = vmor %vm789_vm6, %vm790_vm5 }
 0x128   : > { %v782_v36 = vsel %vm781_vm4, %v1968_v26, %v778_v33  ;;  %v785_v37 = vmul.f32 %v1970_v32, %v784_v34 }
 0x129   : > { %v793_v39 = vmul.f32 %v782_v36, %v759_v13 }
 0x12a   : > { %v786_v40 = vmul.f32 0.5, %v785_v37 }
 0x12b   : > { %v798_v41 = vmul.f32 %v1963_v35, %v793_v39 }
 0x12c   : > { %v787_v42 = vsub.f32 1.5, %v786_v40 }
 0x12d   : > { %v803_v43 = vadd.f32 %v1964_v38, %v798_v41 }
 0x12e   : > { %v788_v44 = vmul.f32 %v1970_v32, %v787_v42 }
 0x12f   : > { %805 = vst.msk [vmem:[#allocation2] sm:$0xff] %vm743_vm0, %v803_v43 }
 0x130   : > { %v792_v45 = vsel %vm791_vm7, %v1970_v32, %v788_v44 }
 0x131   : > { %v794_v46 = vmul.f32 %v792_v45, %v760_v18 }
 0x133   : > { %v799_v47 = vmul.f32 %v1963_v35, %v794_v46 }
 0x135   : > { %v804_v48 = vadd.f32 %v1964_v38, %v799_v47 }
 0x137   : > { %806 = vst.msk [vmem:[#allocation2 + $0x8] sm:$0xff] %vm743_vm0, %v804_v48 }
 0x138 PF: > { %v1921_v49 = vld [vmem:[%s2204_s22 + $0x8] sm:$0xff]  ;;  %v1920_v50 = vld [vmem:[%s2204_s22] sm:$0xff]  ;;  %vm830_vm8 = vcmask 261120   ;;  %s2514_s23 = scalar_lea.vmem %s2482_s5, %s2194_s29  ;;  %s2071_s22 = smov 96   ;;  %vm861_vm9 = vcmask 64512   ;;  %vm898_vm10 = vcmask 1043456  }
 0x139   : > { %v2271_v51 = vld [vmem:[#allocation2] sm:$0xff]  ;;  %840 = vmatpush.bf16.msra.mxu0 %v1921_v49  ;;  %s2072_s24 = smov 104   ;;  %s2073_s26 = smov 120   ;;  %vm979_vm11 = vcmask 130112   ;;  %vm1041_vm12 = vcmask 195712   ;;  %vm1103_vm13 = vcmask 261312  }
 0x13a   : > { %v1971_v54 = vld [vmem:[%s2514_s23] ss:$0 sm:$0xff]  ;;  %s2074_s1 = smov 88   ;;  %s2075_s17 = smov 80   ;;  %vm1548_vm5 = vcmask 523264  }
 0x13b   : > { %s2076_s18 = smov 72   ;;  %s2077_s19 = smov 112  }
 0x13c   : > { %s2078_s30 = smov 56   ;;  %s2515_s23 = sld [smem:[#allocation10_spill]] }
 0x13d   : > { %841 = vmatpush.bf16.msra.mxu0 %v1920_v50  ;;  %s2517_s2 = scalar_lea.vmem %s2484_s7, %s2194_s29  ;;  %p1902_p5 = scmp.ne.s32.totalorder %s2188_s28, 1 }
 0x13e   : > { %v2273_v52 = vld [vmem:[#allocation2 + $0x8] sm:$0xff] }
 0x13f   : > { %v809_v53 = vpack.c.bf16 %v2273_v52, %v2271_v51 }
 0x141   : > { %1850 = vmatmul.msk.bf16.vlgmr.msra.gmra.mxu0 %vm830_vm8, %v809_v53 }
 0x142   : > { %v854_v31 = vld [vmem:[%s2515_s23] sm:$0x3] }
 0x143   : > { %v855_v32 = vperm.slane %v854_v31, 0  ;;  %v1105_v45 = vperm.slane %v854_v31, 1 }
 0x1be   : > { %v843_v55 = vpop.f32.mrf.mxu0 }
 0x1bf   : > { %v844_v56 = vadd.f32 %v1971_v54, %v843_v55 }
 0x1c1   : > { %v848_v57 = vmul.f32 0.35355338, %v844_v56  ;;  %v852_v58 = vpack.c.bf16 %v844_v56, %v844_v56 }
 0x1c3   : > { %v850_v59 = vpack.c.bf16 %v848_v57, %v848_v57  ;;  %v857_v60 = vunpack.c.l.b16 %v852_v58 }
 0x1c5   : > { %v2283_v61 = vpack.c.b16 %v857_v60, %v857_v60  ;;  %v917_v62 = vunpack.c.l.b16 %v850_v59 }
 0x1c6   : > { %v845_v63 = vpop.f32.mrf.mxu0 }
 0x1c7   : > { %v846_v0 = vadd.f32 %v1971_v54, %v845_v63  ;;  %859 = vrot.lane.b32.xlu0 %v2283_v61, %s2071_s22  ;;  %v918_v1 = vpack.c.b16 %v917_v62, %v917_v62 }
 0x1c9   : > { %1043 = vrot.lane.b32.xlu2 %v918_v1, %s2072_s24  ;;  %919 = vrot.lane.b32.xlu1 %v918_v1, %s2073_s26  ;;  %v849_v2 = vmul.f32 0.35355338, %v846_v0  ;;  %v853_v3 = vpack.c.bf16 %v846_v0, %v846_v0 }
 0x1cb   : > { %v851_v4 = vpack.c.bf16 %v849_v2, %v849_v2  ;;  %v1107_v5 = vunpack.c.l.b16 %v853_v3 }
 0x1cd   : > { %v1165_v6 = vunpack.c.l.b16 %v851_v4  ;;  %v2289_v7 = vpack.c.b16 %v1107_v5, %v1107_v5 }
 0x1cf   : > { %921 = vrot.lane.b32.xlu0 %v2283_v61, %s2074_s1  ;;  %v1166_v8 = vpack.c.b16 %v1165_v6, %v1165_v6 }
 0x1d1   : > { %983 = vrot.lane.b32.xlu2 %v2283_v61, %s2075_s17  ;;  %1045 = vrot.lane.b32.xlu1 %v2283_v61, %s2076_s18 }
 0x1d7   : > { %1169 = vrot.lane.b32.xlu0 %v2289_v7, %s2074_s1  ;;  %s2082_s1 = smov 16  }
 0x1d9   : > { %1167 = vrot.lane.b32.xlu2 %v1166_v8, %s2073_s26  ;;  %981 = vrot.lane.b32.xlu1 %v918_v1, %s2077_s19  ;;  %s2081_s26 = smov 40  }
 0x1df   : > { %1109 = vrot.lane.b32.xlu0 %v2289_v7, %s2071_s22  ;;  %s2079_s22 = smov 64  }
 0x1e1   : > { %1289 = vrot.lane.b32.xlu2 %v1166_v8, %s2072_s24  ;;  %1291 = vrot.lane.b32.xlu1 %v2289_v7, %s2076_s18  ;;  %s2080_s24 = smov 48   ;;  %s2084_s18 = smov 24  }
 0x1e7   : > { %1230 = vrot.lane.b32.xlu0 %v2289_v7, %s2075_s17  ;;  %s2083_s17 = smov 8  }
 0x1e9   : > { %1228 = vrot.lane.b32.xlu1 %v1166_v8, %s2077_s19  ;;  %s2516_s19 = sld [smem:[#allocation8_spill]] }
 0x1f1   : > { %954 = vrot.lane.b32.xlu1 %v2283_v61, %s2078_s30 }
 0x223   : > { %v1044_v9 = vpop.permute.xlu2 %1043 }
 0x22b   : > { %v984_v10 = vpop.permute.xlu2 %983 }
 0x22c   : > { %v989_v11 = vsel %vm861_vm9, %v984_v10, 0 }
 0x22d   : > { %998 = vmatpush.bf16.xpose.msrb.mxu0 %v989_v11 }
 0x233   : > { %v1168_v28 = vpop.permute.xlu2 %1167 }
 0x239   : > { %v860_v12 = vpop.permute.xlu0 %859 }
 0x23a   : > { %v866_v13 = vsel %vm861_vm9, %v860_v12, 0 }
 0x23b   : > { %875 = vmatpush.bf16.xpose.msra.mxu1 %v866_v13  ;;  %v920_v14 = vpop.permute.xlu1 %919  ;;  %v1290_v30 = vpop.permute.xlu2 %1289 }
 0x241   : > { %v922_v15 = vpop.permute.xlu0 %921 }
 0x242   : > { %1851 = vmatmul.msk.bf16.vlgmr.msra.gmra.mxu1 %vm861_vm9, %v850_v59  ;;  %v927_v16 = vsel %vm861_vm9, %v922_v15, 0 }
 0x243   : > { %936 = vmatpush.bf16.xpose.msra.mxu3 %v927_v16  ;;  %v1046_v17 = vpop.permute.xlu1 %1045 }
 0x244   : > { %v1051_v18 = vsel %vm861_vm9, %v1046_v17, 0 }
 0x249   : > { %v1170_v19 = vpop.permute.xlu0 %1169 }
 0x24a   : > { %v1175_v20 = vsel %vm861_vm9, %v1170_v19, 0  ;;  %1853 = vmatmul.msk.bf16.vlgmr.msra.gmra.mxu3 %vm861_vm9, %v920_v14 }
 0x24b   : > { %1060 = vmatpush.bf16.xpose.msrb.mxu3 %v1051_v18  ;;  %v982_v21 = vpop.permute.xlu1 %981 }
 0x24c   : > { %1855 = vmatmul.msk.bf16.vlgmr.msrb.gmra.mxu0 %vm861_vm9, %v982_v21 }
 0x251   : > { %v1110_v22 = vpop.permute.xlu0 %1109 }
 0x252   : > { %v1115_v23 = vsel %vm861_vm9, %v1110_v22, 0 }
 0x253   : > { %1184 = vmatpush.bf16.xpose.msra.mxu3 %v1175_v20  ;;  %1124 = vmatpush.bf16.xpose.msra.mxu0 %v1115_v23  ;;  %v1292_v24 = vpop.permute.xlu1 %1291 }
 0x254   : > { %v1297_v26 = vsel %vm861_vm9, %v1292_v24, 0 }
 0x259   : > { %v1231_v25 = vpop.permute.xlu0 %1230 }
 0x25a   : > { %v1236_v27 = vsel %vm861_vm9, %v1231_v25, 0  ;;  %1857 = vmatmul.msk.bf16.vlgmr.msrb.gmra.mxu3 %vm861_vm9, %v1044_v9 }
 0x25b   : > { %1306 = vmatpush.bf16.xpose.msrb.mxu3 %v1297_v26  ;;  %1245 = vmatpush.bf16.xpose.msrb.mxu0 %v1236_v27  ;;  %v1229_v29 = vpop.permute.xlu1 %1228 }
 0x25c   : > { %1859 = vmatmul.msk.bf16.vlgmr.msra.gmra.mxu0 %vm861_vm9, %v851_v4 }
 0x263   : > { %v955_v16 = vpop.permute.xlu1 %954 }
 0x264   : > { %v960_v20 = vsel %vm898_vm10, %v955_v16, 0 }
 0x26a   : > { %1861 = vmatmul.msk.bf16.vlgmr.msra.gmra.mxu3 %vm861_vm9, %v1168_v28 }
 0x26c   : > { %1863 = vmatmul.msk.bf16.vlgmr.msrb.gmra.mxu0 %vm861_vm9, %v1229_v29 }
 0x27a   : > { %1865 = vmatmul.msk.bf16.vlgmr.msrb.gmra.mxu3 %vm861_vm9, %v1290_v30 }
 0x2bf   : > { %v877_v33 = vpop.f32.mrf.mxu1 }
 0x2c0   : > { %v878_v34 = vadd.f32 %v877_v33, %v855_v32 }
 0x2c2   : > { %v881_v35 = vsel %vm861_vm9, %v878_v34, -inf }
 0x2c3   : > { %882 = vmax.xlane.f32.xlu2 %v881_v35 }
 0x2c7   : > { %v879_v36 = vpop.f32.mrf.mxu1 }
 0x2c9   : > { %v1000_v37 = vpop.f32.mrf.mxu0 }
 0x2ca   : > { %v1001_v38 = vadd.f32 %v1000_v37, %v855_v32 }
 0x2cc   : > { %v1004_v39 = vsel %vm861_vm9, %v1001_v38, -inf }
 0x2cd   : > { %v938_v40 = vpop.f32.mrf.mxu3  ;;  %1005 = vmax.xlane.f32.xlu2 %v1004_v39 }
 0x2ce   : > { %v939_v41 = vadd.f32 %v938_v40, %v855_v32 }
 0x2d0   : > { %v942_v42 = vsel %vm861_vm9, %v939_v41, -inf }
 0x2d1   : > { %943 = vmax.xlane.f32.xlu0 %v942_v42  ;;  %v1002_v43 = vpop.f32.mrf.mxu0 }
 0x2d5   : > { %v940_v44 = vpop.f32.mrf.mxu3 }
 0x2d9   : > { %v1126_v46 = vpop.f32.mrf.mxu0 }
 0x2da   : > { %v2319_v47 = vadd.f32 %v1126_v46, %v1105_v45 }
 0x2dc   : > { %v1130_v48 = vsel %vm861_vm9, %v2319_v47, -inf }
 0x2dd   : > { %v1062_v49 = vpop.f32.mrf.mxu3  ;;  %1131 = vmax.xlane.f32.xlu1 %v1130_v48 }
 0x2de   : > { %v2323_v50 = vadd.f32 %v1062_v49, %v855_v32 }
 0x2e0   : > { %v1066_v54 = vsel %vm861_vm9, %v2323_v50, -inf }
 0x2e1   : > { %v1128_v53 = vpop.f32.mrf.mxu0 }
 0x2e5   : > { %v1064_v55 = vpop.f32.mrf.mxu3  ;;  %1067 = vmax.xlane.f32.xlu1 %v1066_v54  ;;  %893 = vrot.lane.b32.xlu2 %v2283_v61, %s2079_s22 }
 0x2e9   : > { %v1247_v56 = vpop.f32.mrf.mxu0 }
 0x2ea   : > { %v2329_v57 = vadd.f32 %v1247_v56, %v1105_v45 }
 0x2ec   : > { %v1251_v58 = vsel %vm861_vm9, %v2329_v57, -inf }
 0x2ed   : > { %v1186_v59 = vpop.f32.mrf.mxu3  ;;  %1252 = vmax.xlane.f32.xlu0 %v1251_v58 }
 0x2ee   : > { %v1187_v3 = vadd.f32 %v1186_v59, %v1105_v45 }
 0x2f0   : > { %v1190_v4 = vsel %vm861_vm9, %v1187_v3, -inf }
 0x2f1   : > { %v1249_v60 = vpop.f32.mrf.mxu0 }
 0x2f5   : > { %v1188_v62 = vpop.f32.mrf.mxu3 }
 0x2fd   : > { %v1308_v63 = vpop.f32.mrf.mxu3 }
 0x2fe   : > { %v1309_v0 = vadd.f32 %v1308_v63, %v1105_v45  ;;  %1016 = vrot.lane.b32.xlu1 %v2283_v61, %s2080_s24 }
 0x300   : > { %v1312_v1 = vsel %vm861_vm9, %v1309_v0, -inf }
 0x301   : > { %1313 = vmax.xlane.f32.xlu0 %v1312_v1 }
 0x305   : > { %v1310_v2 = vpop.f32.mrf.mxu3 }
 0x30e   : > { %1191 = vmax.xlane.f32.xlu2 %v1190_v4 }
 0x336   : > { %v883_v5 = vpop.xlane.xlu2 %882 }
 0x337   : > { %v884_v6 = vsub.f32 %v878_v34, %v883_v5 }
 0x339   : > { %v885_v8 = vmul.f32 1.442695, %v884_v6 }
 0x33b   : > { %1979 = vpow2.f32 %v885_v8 }
 0x340   : > { %v1006_v9 = vpop.xlane.xlu2 %1005 }
 0x341   : > { %v2337_v10 = vpop.eup %1979  ;;  %v1007_v11 = vsub.f32 %v1001_v38, %v1006_v9 }
 0x342   : > { %v887_v12 = vsel %vm861_vm9, %v2337_v10, 0.0 }
 0x343   : > { %v1008_v13 = vmul.f32 1.442695, %v1007_v11  ;;  %888 = vadd.xlane.f32.xlu0 %v887_v12 }
 0x344   : > { %v944_v14 = vpop.xlane.xlu0 %943 }
 0x345   : > { %1981 = vpow2.f32 %v1008_v13  ;;  %v945_v15 = vsub.f32 %v939_v41, %v944_v14 }
 0x347   : > { %v946_v17 = vmul.f32 1.442695, %v945_v15 }
 0x348   : > { %v894_v18 = vpop.permute.xlu2 %893 }
 0x349   : > { %1983 = vpow2.f32 %v946_v17  ;;  %v900_v19 = vsel %vm898_vm10, %v894_v18, 0 }
 0x34a   : > { %909 = vmatpush.bf16.msra.mxu2 %v900_v19 }
 0x34b   : > { %v1982_v21 = vpop.eup %1981 }
 0x34c   : > { %v1010_v22 = vsel %vm861_vm9, %v1982_v21, 0.0 }
 0x34d   : > { %1011 = vadd.xlane.f32.xlu2 %v1010_v22 }
 0x34e   : > { %969 = vmatpush.bf16.msrb.mxu2 %v960_v20 }
 0x34f   : > { %v2344_v23 = vpop.eup %1983 }
 0x350   : > { %v948_v24 = vsel %vm861_vm9, %v2344_v23, 0.0  ;;  %v1132_v25 = vpop.xlane.xlu1 %1131 }
 0x351   : > { %949 = vadd.xlane.f32.xlu1 %v948_v24  ;;  %v1133_v27 = vsub.f32 %v2319_v47, %v1132_v25 }
 0x353   : > { %v1134_v30 = vmul.f32 1.442695, %v1133_v27 }
 0x355   : > { %1985 = vpow2.f32 %v1134_v30 }
 0x357   : > { %1078 = vrot.lane.b32.xlu0 %v2283_v61, %s2081_s26 }
 0x358   : > { %v1068_v26 = vpop.xlane.xlu1 %1067 }
 0x359   : > { %v1069_v32 = vsub.f32 %v2323_v50, %v1068_v26 }
 0x35b   : > { %v1070_v61 = vmul.f32 1.442695, %v1069_v32  ;;  %v1986_v35 = vpop.eup %1985 }
 0x35c   : > { %v1136_v38 = vsel %vm861_vm9, %v1986_v35, 0.0 }
 0x35d   : > { %1987 = vpow2.f32 %v1070_v61 }
 0x360   : > { %v1253_v31 = vpop.xlane.xlu0 %1252 }
 0x361   : > { %v1254_v33 = vsub.f32 %v2329_v57, %v1253_v31 }
 0x363   : > { %v1255_v37 = vmul.f32 1.442695, %v1254_v33  ;;  %v1988_v42 = vpop.eup %1987 }
 0x364   : > { %v1072_v44 = vsel %vm861_vm9, %v1988_v42, 0.0 }
 0x365   : > { %1202 = vrot.lane.b32.xlu2 %v2289_v7, %s2078_s30  ;;  %1989 = vpow2.f32 %v1255_v37 }
 0x36a   : > { %1142 = vrot.lane.b32.xlu1 %v2289_v7, %s2079_s22  ;;  %s2518_s22 = scalar_lea.vmem %s2485_s8, %s2194_s29 }
 0x36b   : > { %v2360_v45 = vpop.eup %1989 }
 0x36c   : > { %v1257_v47 = vsel %vm861_vm9, %v2360_v45, 0.0 }
 0x370   : > { %v1017_v28 = vpop.permute.xlu1 %1016 }
 0x371   : > { %v1022_v29 = vsel %vm898_vm10, %v1017_v28, 0 }
 0x372   : > { %1031 = vmatpush.bf16.msrb.mxu1 %v1022_v29 }
 0x374   : > { %v1314_v34 = vpop.xlane.xlu0 %1313 }
 0x375   : > { %v1315_v36 = vsub.f32 %v1309_v0, %v1314_v34 }
 0x377   : > { %v1316_v41 = vmul.f32 1.442695, %v1315_v36 }
 0x379   : > { %1991 = vpow2.f32 %v1316_v41 }
 0x37f   : > { %v2362_v46 = vpop.eup %1991 }
 0x380   : > { %v1318_v49 = vsel %vm861_vm9, %v2362_v46, 0.0 }
 0x381   : > { %1137 = vadd.xlane.f32.xlu0 %v1136_v38  ;;  %v1192_v39 = vpop.xlane.xlu2 %1191 }
 0x382   : > { %v1193_v40 = vsub.f32 %v1187_v3, %v1192_v39 }
 0x384   : > { %v1194_v43 = vmul.f32 1.442695, %v1193_v40 }
 0x386   : > { %1993 = vpow2.f32 %v1194_v43 }
 0x389   : > { %1073 = vadd.xlane.f32.xlu0 %v1072_v44 }
 0x38c   : > { %v1994_v48 = vpop.eup %1993 }
 0x38d   : > { %v1196_v50 = vsel %vm861_vm9, %v1994_v48, 0.0 }
 0x38e   : > { %1258 = vadd.xlane.f32.xlu2 %v1257_v47 }
 0x391   : > { %1319 = vadd.xlane.f32.xlu0 %v1318_v49 }
 0x394   : > { %1197 = vadd.xlane.f32.xlu1 %v1196_v50  ;;  %v1923_v50 = vld [vmem:[%s2516_s19 + $0x8] sm:$0xff] }
 0x395   : > { %1382 = vmatpush.bf16.msra.mxu0 %v1923_v50 }
 0x3a5   : > { %1324 = vrot.lane.b32.xlu0 %v2289_v7, %s2081_s26 }
 0x3ad   : > { %1263 = vrot.lane.b32.xlu1 %v2289_v7, %s2080_s24  ;;  %s2521_s24 = sld [smem:[#allocation15_spill]] (!%p1902_p5) }
 0x3b6   : > { %v889_v53 = vpop.xlane.xlu0 %888 }
 0x3b7   : > { %1995 = vrcp.f32 %v889_v53  ;;  %v1922_v53 = vld [vmem:[%s2516_s19] sm:$0xff] }
 0x3b8   : > { %1383 = vmatpush.bf16.msra.mxu0 %v1922_v53  ;;  %v1929_v53 = vld [vmem:[%s2236_s27 + $0x18] sm:$0xff] }
 0x3b9   : > { %1556 = vmatpush.bf16.msra.mxu3 %v1929_v53  ;;  %v1978_v53 = vld [vmem:[%s733_s16] ss:$0 sm:$0xff] }
 0x3bd   : > { %v1996_v54 = vpop.eup %1995 }
 0x3be   : > { %v891_v55 = vmul.f32 %v1996_v54, %v2337_v10 }
 0x3c0   : > { %v1012_v56 = vpop.xlane.xlu2 %1011  ;;  %v892_v57 = vpack.c.bf16 %v891_v55, %v891_v55 }
 0x3c1   : > { %1997 = vrcp.f32 %v1012_v56 }
 0x3c2   : > { %1852 = vmatmul.msk.bf16.vlgmr.msra.gmra.mxu2 %vm861_vm9, %v892_v57 }
 0x3c4   : > { %v950_v58 = vpop.xlane.xlu1 %949 }
 0x3c5   : > { %1999 = vrcp.f32 %v950_v58 }
 0x3c7   : > { %v1998_v59 = vpop.eup %1997 }
 0x3c8   : > { %v1014_v60 = vmul.f32 %v1998_v59, %v1982_v21  ;;  %v1203_v2 = vpop.permute.xlu2 %1202 }
 0x3c9   : > { %v1079_v62 = vpop.permute.xlu0 %1078  ;;  %v1208_v4 = vsel %vm898_vm10, %v1203_v2, 0 }
 0x3ca   : > { %v1084_v63 = vsel %vm898_vm10, %v1079_v62, 0  ;;  %v1015_v0 = vpack.c.bf16 %v1014_v60, %v1014_v60  ;;  %v1972_v60 = vld [vmem:[%s2517_s2] ss:$0 sm:$0xff] }
 0x3cb   : > { %v2000_v1 = vpop.eup %1999  ;;  %1093 = vmatpush.bf16.msra.mxu2 %v1084_v63 }
 0x3cc   : > { %v952_v7 = vmul.f32 %v2000_v1, %v2344_v23  ;;  %1856 = vmatmul.msk.bf16.vlgmr.msrb.gmra.mxu1 %vm861_vm9, %v1015_v0 }
 0x3ce   : > { %v953_v3 = vpack.c.bf16 %v952_v7, %v952_v7 }
 0x3d2   : > { %1854 = vmatmul.msk.bf16.vlgmr.msrb.gmra.mxu2 %vm861_vm9, %v953_v3 }
 0x3d3   : > { %1217 = vmatpush.bf16.msrb.mxu2 %v1208_v4 }
 0x3dc   : > { %v1143_v5 = vpop.permute.xlu1 %1142 }
 0x3dd   : > { %v1148_v6 = vsel %vm898_vm10, %v1143_v5, 0  ;;  %v2085_v5 = vmov 32.0  }
 0x3de   : > { %1157 = vmatpush.bf16.msra.mxu1 %v1148_v6 }
 0x3f4   : > { %v1138_v8 = vpop.xlane.xlu0 %1137 }
 0x3f5   : > { %2001 = vrcp.f32 %v1138_v8 }
 0x3fb   : > { %v2002_v9 = vpop.eup %2001 }
 0x3fc   : > { %v1140_v10 = vmul.f32 %v2002_v9, %v1986_v35  ;;  %v1074_v11 = vpop.xlane.xlu0 %1073 }
 0x3fd   : > { %2003 = vrcp.f32 %v1074_v11 }
 0x3fe   : > { %v1141_v12 = vpack.c.bf16 %v1140_v10, %v1140_v10 }
 0x400   : > { %1860 = vmatmul.msk.bf16.vlgmr.msra.gmra.mxu1 %vm861_vm9, %v1141_v12 }
 0x401   : > { %v1259_v19 = vpop.xlane.xlu2 %1258 }
 0x403   : > { %v2004_v13 = vpop.eup %2003 }
 0x404   : > { %v1076_v14 = vmul.f32 %v2004_v13, %v1988_v42  ;;  %v1320_v18 = vpop.xlane.xlu0 %1319 }
 0x406   : > { %v1077_v15 = vpack.c.bf16 %v1076_v14, %v1076_v14 }
 0x407   : > { %v1198_v16 = vpop.xlane.xlu1 %1197 }
 0x408   : > { %1858 = vmatmul.msk.bf16.vlgmr.msra.gmra.mxu2 %vm861_vm9, %v1077_v15  ;;  %2005 = vrcp.f32 %v1198_v16 }
 0x409   : > { %2007 = vrcp.f32 %v1259_v19 }
 0x40a   : > { %2009 = vrcp.f32 %v1320_v18 }
 0x40b   : > { %2011 = vrcp.f32 %v2085_v5 }
 0x40e   : > { %v2006_v17 = vpop.eup %2005 }
 0x40f   : > { %v1200_v20 = vmul.f32 %v2006_v17, %v1994_v48  ;;  %v2008_v24 = vpop.eup %2007 }
 0x410   : > { %v1261_v25 = vmul.f32 %v2008_v24, %v2360_v45  ;;  %v2010_v26 = vpop.eup %2009 }
 0x411   : > { %v1201_v21 = vpack.c.bf16 %v1200_v20, %v1200_v20  ;;  %v1322_v30 = vmul.f32 %v2010_v26, %v2362_v46  ;;  %v2012_v6 = vpop.eup %2011 }
 0x412   : > { %v1262_v29 = vpack.c.bf16 %v1261_v25, %v1261_v25  ;;  %v1401_v8 = vmul.f32 32.0, %v2012_v6  ;;  %vm1405_vm14 = vweird.f32 %v2012_v6  ;;  %v1924_v25 = vld [vmem:[%s2226_s4] sm:$0xff] }
 0x413   : > { %v1323_v31 = vpack.c.bf16 %v1322_v30, %v1322_v30 }
 0x414   : > { %v1402_v9 = vsub.f32 1.0, %v1401_v8 }
 0x416   : > { %v1403_v10 = vmul.f32 %v2012_v6, %v1402_v9 }
 0x417   : > { %v1325_v22 = vpop.permute.xlu0 %1324 }
 0x418   : > { %v1330_v23 = vsel %vm898_vm10, %v1325_v22, 0  ;;  %1862 = vmatmul.msk.bf16.vlgmr.msrb.gmra.mxu2 %vm861_vm9, %v1201_v21  ;;  %v1404_v11 = vadd.f32 %v2012_v6, %v1403_v10  ;;  %v1925_v21 = vld [vmem:[%s2226_s4 + $0x8] sm:$0xff] }
 0x419   : > { %1339 = vmatpush.bf16.msra.mxu2 %v1330_v23 }
 0x41f   : > { %v1264_v27 = vpop.permute.xlu1 %1263 }
 0x420   : > { %v1269_v28 = vsel %vm898_vm10, %v1264_v27, 0 }
 0x421   : > { %1278 = vmatpush.bf16.msrb.mxu1 %v1269_v28 }
 0x424   : > { %1864 = vmatmul.msk.bf16.vlgmr.msrb.gmra.mxu1 %vm861_vm9, %v1262_v29 }
 0x425   : > { %1485 = vmatpush.bf16.msra.mxu1 %v1925_v21 }
 0x428   : > { %1866 = vmatmul.msk.bf16.vlgmr.msra.gmra.mxu2 %vm861_vm9, %v1323_v31 }
 0x429   : > { %1486 = vmatpush.bf16.msra.mxu1 %v1924_v25 }
 0x445   : > { %v911_v32 = vpop.f32.mrf.mxu2 }
 0x446   : > { %915 = vst.msk [vmem:[#allocation3] sm:$0xff] %vm861_vm9, %v911_v32 }
 0x449   : > { %v1033_v61 = vpop.f32.mrf.mxu1 }
 0x44a   : > { %1038 = vrot.lane.b32.xlu0 %v1033_v61, %s2082_s1 }
 0x44d   : > { %v913_v33 = vpop.f32.mrf.mxu2 }
 0x451   : > { %v1035_v34 = vpop.f32.mrf.mxu1 }
 0x455   : > { %v971_v35 = vpop.f32.mrf.mxu2 }
 0x456   : > { %976 = vrot.lane.b32.xlu0 %v971_v35, %s2083_s17 }
 0x45d   : > { %v973_v36 = vpop.f32.mrf.mxu2 }
 0x47d   : > { %v1159_v37 = vpop.f32.mrf.mxu1 }
 0x47e   : > { %1163 = vst.msk [vmem:[#allocation3 + $0x8] sm:$0xff] %vm861_vm9, %v1159_v37 }
 0x485   : > { %v1161_v38 = vpop.f32.mrf.mxu1 }
 0x48b   : > { %v1095_v39 = vpop.f32.mrf.mxu2 }
 0x48c   : > { %1100 = vrot.lane.b32.xlu2 %v1095_v39, %s2084_s18 }
 0x493   : > { %v1097_v40 = vpop.f32.mrf.mxu2 }
 0x494   : > { %v1973_v40 = vld [vmem:[%s2518_s22] ss:$0 sm:$0xff] }
 0x49b   : > { %v1219_v41 = vpop.f32.mrf.mxu2 }
 0x49c   : > { %1224 = vrot.lane.b32.xlu1 %v1219_v41, %s2083_s17 }
 0x4a1   : > { %v1280_v42 = vpop.f32.mrf.mxu1 }
 0x4a3   : > { %v1221_v43 = vpop.f32.mrf.mxu2 }
 0x4a4   : > { %1285 = vrot.lane.b32.xlu1 %v1280_v42, %s2082_s1  ;;  %s2519_s1 = scalar_lea.vmem %s2486_s9, %s2194_s29 }
 0x4a9   : > { %v1282_v44 = vpop.f32.mrf.mxu1 }
 0x4aa   : > { %v1974_v44 = vld [vmem:[%s2519_s1] ss:$0 sm:$0xff] }
 0x4ab   : > { %v1341_v45 = vpop.f32.mrf.mxu2 }
 0x4ac   : > { %1346 = vrot.lane.b32.xlu0 %v1341_v45, %s2084_s18 }
 0x4b3   : > { %v1343_v46 = vpop.f32.mrf.mxu2 }
 0x4bc   : > { %v1039_v47 = vpop.permute.xlu0 %1038 }
 0x4c8   : > { %v977_v48 = vpop.permute.xlu0 %976 }
 0x4c9   : > { %980 = vst.msk [vmem:[#allocation3] sm:$0xff] %vm979_vm11, %v977_v48 }
 0x4ca   : > { %1042 = vst.msk [vmem:[#allocation3] sm:$0xff] %vm1041_vm12, %v1039_v47 }
 0x4e6   : > { %v1101_v49 = vpop.permute.xlu2 %1100 }
 0x4e7   : > { %1104 = vst.msk [vmem:[#allocation3] sm:$0xff] %vm1103_vm13, %v1101_v49 }
 0x4ee   : > { %v1350_v57 = vld [vmem:[#allocation3] sm:$0xff] }
 0x50e   : > { %v1225_v54 = vpop.permute.xlu1 %1224 }
 0x50f   : > { %1227 = vst.msk [vmem:[#allocation3 + $0x8] sm:$0xff] %vm979_vm11, %v1225_v54  ;;  %v1928_v54 = vld [vmem:[%s2236_s27 + $0x10] sm:$0xff] }
 0x510   : > { %1557 = vmatpush.bf16.msra.mxu3 %v1928_v54 }
 0x516   : > { %v1286_v55 = vpop.permute.xlu1 %1285 }
 0x517   : > { %1288 = vst.msk [vmem:[#allocation3 + $0x8] sm:$0xff] %vm1041_vm12, %v1286_v55  ;;  %v1927_v55 = vld [vmem:[%s2236_s27 + $0x8] sm:$0xff] }
 0x518   : > { %1558 = vmatpush.bf16.msra.mxu3 %v1927_v55 }
 0x51e   : > { %v1347_v56 = vpop.permute.xlu0 %1346 }
 0x51f   : > { %1349 = vst.msk [vmem:[#allocation3 + $0x8] sm:$0xff] %vm1103_vm13, %v1347_v56  ;;  %v1926_v56 = vld [vmem:[%s2236_s27] sm:$0xff] }
 0x520   : > { %1559 = vmatpush.bf16.msra.mxu3 %v1926_v56 }
 0x526   : > { %v1351_v58 = vld [vmem:[#allocation3 + $0x8] sm:$0xff] }
 0x527   : > { %v1352_v59 = vpack.c.bf16 %v1351_v58, %v1350_v57  ;;  %v1975_v57 = vld [vmem:[%s719_s6] ss:$0 sm:$0xff] }
 0x529   : > { %1875 = vmatmul.msk.bf16.vlgmr.msra.gmra.mxu0 %vm830_vm8, %v1352_v59 }
 0x5a6   : > { %v1385_v62 = vpop.f32.mrf.mxu0 }
 0x5a7   : > { %v1386_v63 = vadd.f32 %v1972_v60, %v1385_v62 }
 0x5a9   : > { %v1390_v0 = vadd.f32 %v1386_v63, %v2271_v51  ;;  %v2404_v51 = vsel %vm1405_vm14, %v2012_v6, %v1404_v11 }
 0x5ab   : > { %v1394_v1 = vsel %vm830_vm8, %v1390_v0, 0.0 }
 0x5ac   : > { %1395 = vadd.xlane.f32.xlu1 %v1394_v1 }
 0x5ae   : > { %v1387_v7 = vpop.f32.mrf.mxu0 }
 0x5af   : > { %v1388_v2 = vadd.f32 %v1972_v60, %v1387_v7 }
 0x5b1   : > { %v1391_v3 = vadd.f32 %v1388_v2, %v2273_v52 }
 0x5b3   : > { %v1397_v4 = vsel %vm830_vm8, %v1391_v3, 0.0 }
 0x5b4   : > { %1398 = vadd.xlane.f32.xlu0 %v1397_v4 }
 0x61f   : > { %v1396_v12 = vpop.xlane.xlu1 %1395 }
 0x620   : > { %v1407_v13 = vmul.f32 %v2404_v51, %v1396_v12 }
 0x622   : > { %v1409_v14 = vsub.f32 %v1390_v0, %v1407_v13 }
 0x624   : > { %v1411_v52 = vmul.f32 %v1409_v14, %v1409_v14 }
 0x626   : > { %v1413_v15 = vsel %vm830_vm8, %v1411_v52, 0.0 }
 0x627   : > { %v1399_v16 = vpop.xlane.xlu0 %1398  ;;  %1414 = vadd.xlane.f32.xlu2 %v1413_v15 }
 0x628   : > { %v1408_v17 = vmul.f32 %v2404_v51, %v1399_v16 }
 0x62a   : > { %v1410_v18 = vsub.f32 %v1391_v3, %v1408_v17  ;;  %v1976_v17 = vld [vmem:[%s727_s0] ss:$0 sm:$0xff] }
 0x62c   : > { %v1412_v19 = vmul.f32 %v1410_v18, %v1410_v18 }
 0x62e   : > { %v1416_v20 = vsel %vm830_vm8, %v1412_v19, 0.0 }
 0x62f   : > { %1417 = vadd.xlane.f32.xlu1 %v1416_v20 }
 0x69a   : > { %v1415_v22 = vpop.xlane.xlu2 %1414 }
 0x69b   : > { %v1419_v23 = vmul.f32 %v1415_v22, %v2404_v51 }
 0x69d   : > { %v1421_v24 = vadd.f32 1e-12, %v1419_v23 }
 0x69f   : > { %2013 = vrsqrt.f32 %v1421_v24  ;;  %vm1429_vm0 = vweird.f32 %v1421_v24 }
 0x6a2   : > { %v1418_v26 = vpop.xlane.xlu1 %1417 }
 0x6a3   : > { %v1420_v27 = vmul.f32 %v1418_v26, %v2404_v51 }
 0x6a5   : > { %v2014_v28 = vpop.eup %2013  ;;  %v1422_v29 = vadd.f32 1e-12, %v1420_v27 }
 0x6a6   : > { %v1424_v30 = vmul.f32 %v2014_v28, %v1421_v24  ;;  %vm1430_vm15 = vweird.f32 %v2014_v28 }
 0x6a7   : > { %2015 = vrsqrt.f32 %v1422_v29  ;;  %vm1431_vm1 = vmor %vm1429_vm0, %vm1430_vm15  ;;  %vm1439_vm3 = vweird.f32 %v1422_v29 }
 0x6a8   : > { %v1425_v31 = vmul.f32 %v2014_v28, %v1424_v30 }
 0x6aa   : > { %v1426_v32 = vmul.f32 0.5, %v1425_v31 }
 0x6ac   : > { %v1427_v61 = vsub.f32 1.5, %v1426_v32 }
 0x6ad   : > { %v2016_v33 = vpop.eup %2015 }
 0x6ae   : > { %v1428_v34 = vmul.f32 %v2014_v28, %v1427_v61  ;;  %v1434_v35 = vmul.f32 %v2016_v33, %v1422_v29  ;;  %vm1440_vm2 = vweird.f32 %v2016_v33 }
 0x6af   : > { %vm1441_vm4 = vmor %vm1439_vm3, %vm1440_vm2 }
 0x6b0   : > { %v1435_v36 = vmul.f32 %v2016_v33, %v1434_v35  ;;  %v1432_v37 = vsel %vm1431_vm1, %v2014_v28, %v1428_v34 }
 0x6b1   : > { %v1443_v41 = vmul.f32 %v1432_v37, %v1409_v14 }
 0x6b2   : > { %v1436_v38 = vmul.f32 0.5, %v1435_v36 }
 0x6b3   : > { %v1448_v45 = vmul.f32 %v1973_v40, %v1443_v41 }
 0x6b4   : > { %v1437_v39 = vsub.f32 1.5, %v1436_v38 }
 0x6b5   : > { %v1453_v48 = vadd.f32 %v1974_v44, %v1448_v45 }
 0x6b6   : > { %v1438_v42 = vmul.f32 %v2016_v33, %v1437_v39 }
 0x6b8   : > { %v1442_v43 = vsel %vm1441_vm4, %v2016_v33, %v1438_v42 }
 0x6b9   : > { %v1444_v46 = vmul.f32 %v1442_v43, %v1410_v18 }
 0x6bb   : > { %v1449_v47 = vmul.f32 %v1973_v40, %v1444_v46 }
 0x6bd   : > { %v1454_v49 = vadd.f32 %v1974_v44, %v1449_v47 }
 0x6bf   : > { %v1455_v50 = vpack.c.bf16 %v1454_v49, %v1453_v48 }
 0x6c1   : > { %1884 = vmatmul.msk.bf16.vlgmr.msra.gmra.mxu1 %vm830_vm8, %v1455_v50 }
 0x73e   : > { %v1488_v58 = vpop.f32.mrf.mxu1 }
 0x73f   : > { %v1489_v59 = vadd.f32 %v1975_v57, %v1488_v58 }
 0x741   : > { %v1495_v60 = vmul.f32 0.044715, %v1489_v59  ;;  %v1493_v12 = vmul.f32 0.5, %v1489_v59 }
 0x743   : > { %v1497_v62 = vmul.f32 %v1495_v60, %v1489_v59 }
 0x745   : > { %v1499_v63 = vmul.f32 %v1497_v62, %v1489_v59 }
 0x746   : > { %v1490_v0 = vpop.f32.mrf.mxu1 }
 0x747   : > { %v1501_v1 = vadd.f32 %v1499_v63, %v1489_v59  ;;  %v1491_v7 = vadd.f32 %v1975_v57, %v1490_v0 }
 0x749   : > { %v1496_v2 = vmul.f32 0.044715, %v1491_v7  ;;  %v1503_v3 = vmul.f32 0.7978846, %v1501_v1  ;;  %v1494_v13 = vmul.f32 0.5, %v1491_v7 }
 0x74b   : > { %v1498_v4 = vmul.f32 %v1496_v2, %v1491_v7  ;;  %2017 = vtanh.f32 %v1503_v3 }
 0x74d   : > { %v1500_v5 = vmul.f32 %v1498_v4, %v1491_v7 }
 0x74f   : > { %v1502_v6 = vadd.f32 %v1500_v5, %v1491_v7 }
 0x751   : > { %v1504_v8 = vmul.f32 0.7978846, %v1502_v6  ;;  %v2018_v9 = vpop.eup %2017 }
 0x752   : > { %v1507_v10 = vadd.f32 1.0, %v2018_v9 }
 0x753   : > { %2019 = vtanh.f32 %v1504_v8 }
 0x754   : > { %v1509_v52 = vmul.f32 %v1507_v10, %v1493_v12 }
 0x759   : > { %v2020_v11 = vpop.eup %2019 }
 0x75a   : > { %v1508_v14 = vadd.f32 1.0, %v2020_v11 }
 0x75c   : > { %v1510_v15 = vmul.f32 %v1508_v14, %v1494_v13 }
 0x75e   : > { %v1511_v16 = vpack.c.bf16 %v1510_v15, %v1509_v52 }
 0x760   : > { %1901 = vmatmul.msk.bf16.vlgmr.msra.gmra.mxu3 %vm1548_vm5, %v1511_v16 }
 0x7e3   : > { %v1561_v18 = vpop.f32.mrf.mxu3 }
 0x7e4   : > { %v1562_v19 = vadd.f32 %v1976_v17, %v1561_v18 }
 0x7e6   : > { %v1566_v20 = vadd.f32 %v1562_v19, %v1453_v48 }
 0x7e8   : > { %v1570_v21 = vsel %vm830_vm8, %v1566_v20, 0.0 }
 0x7e9   : > { %1571 = vadd.xlane.f32.xlu0 %v1570_v21 }
 0x7eb   : > { %v1563_v22 = vpop.f32.mrf.mxu3 }
 0x7ec   : > { %v1564_v23 = vadd.f32 %v1976_v17, %v1563_v22 }
 0x7ee   : > { %v1567_v24 = vadd.f32 %v1564_v23, %v1454_v49  ;;  %v1977_v49 = vld [vmem:[%s730_s20] ss:$0 sm:$0xff]  ;;  %s2520_s20 = sld [smem:[#allocation14_spill]] (!%p1902_p5) }
 0x7f0   : > { %v1573_v25 = vsel %vm830_vm8, %v1567_v24, 0.0 }
 0x7f1   : > { %1574 = vadd.xlane.f32.xlu1 %v1573_v25 }
 0x85c   : > { %v1572_v26 = vpop.xlane.xlu0 %1571 }
 0x85d   : > { %v1576_v27 = vmul.f32 %v1572_v26, %v2404_v51 }
 0x85f   : > { %v1578_v28 = vsub.f32 %v1566_v20, %v1576_v27 }
 0x861   : > { %v1580_v29 = vmul.f32 %v1578_v28, %v1578_v28 }
 0x863   : > { %v1582_v30 = vsel %vm830_vm8, %v1580_v29, 0.0 }
 0x864   : > { %v1575_v31 = vpop.xlane.xlu1 %1574  ;;  %1583 = vadd.xlane.f32.xlu0 %v1582_v30 }
 0x865   : > { %v1577_v32 = vmul.f32 %v1575_v31, %v2404_v51 }
 0x867   : > { %v1579_v61 = vsub.f32 %v1567_v24, %v1577_v32 }
 0x869   : > { %v1581_v33 = vmul.f32 %v1579_v61, %v1579_v61 }
 0x86b   : > { %v1585_v34 = vsel %vm830_vm8, %v1581_v33, 0.0 }
 0x86c   : > { %1586 = vadd.xlane.f32.xlu1 %v1585_v34 }
 0x8d7   : > { %v1584_v35 = vpop.xlane.xlu0 %1583 }
 0x8d8   : > { %v1588_v36 = vmul.f32 %v1584_v35, %v2404_v51 }
 0x8da   : > { %v1590_v37 = vadd.f32 1e-12, %v1588_v36 }
 0x8dc   : > { %2021 = vrsqrt.f32 %v1590_v37  ;;  %vm1598_vm7 = vweird.f32 %v1590_v37 }
 0x8df   : > { %v1587_v38 = vpop.xlane.xlu1 %1586 }
 0x8e0   : > { %v1589_v39 = vmul.f32 %v1587_v38, %v2404_v51 }
 0x8e2   : > { %v2022_v40 = vpop.eup %2021  ;;  %v1591_v41 = vadd.f32 1e-12, %v1589_v39 }
 0x8e3   : > { %v1593_v42 = vmul.f32 %v2022_v40, %v1590_v37  ;;  %vm1599_vm6 = vweird.f32 %v2022_v40 }
 0x8e4   : > { %2023 = vrsqrt.f32 %v1591_v41  ;;  %vm1600_vm9 = vmor %vm1598_vm7, %vm1599_vm6  ;;  %vm1608_vm11 = vweird.f32 %v1591_v41 }
 0x8e5   : > { %v1594_v43 = vmul.f32 %v2022_v40, %v1593_v42 }
 0x8e7   : > { %v1595_v44 = vmul.f32 0.5, %v1594_v43 }
 0x8e9   : > { %v1596_v45 = vsub.f32 1.5, %v1595_v44 }
 0x8ea   : > { %v2024_v46 = vpop.eup %2023 }
 0x8eb   : > { %v1597_v47 = vmul.f32 %v2022_v40, %v1596_v45  ;;  %v1603_v48 = vmul.f32 %v2024_v46, %v1591_v41  ;;  %vm1609_vm10 = vweird.f32 %v2024_v46 }
 0x8ec   : > { %vm1610_vm12 = vmor %vm1608_vm11, %vm1609_vm10 }
 0x8ed   : > { %v1601_v51 = vsel %vm1600_vm9, %v2022_v40, %v1597_v47  ;;  %v1604_v50 = vmul.f32 %v2024_v46, %v1603_v48 }
 0x8ee   : > { %v1612_v54 = vmul.f32 %v1601_v51, %v1578_v28 }
 0x8ef   : > { %v1605_v55 = vmul.f32 0.5, %v1604_v50 }
 0x8f0   : > { %v1617_v56 = vmul.f32 %v1977_v49, %v1612_v54 }
 0x8f1   : > { %v1606_v57 = vsub.f32 1.5, %v1605_v55 }
 0x8f2   : > { %v1622_v58 = vadd.f32 %v1978_v53, %v1617_v56 }
 0x8f3   : > { %v1607_v59 = vmul.f32 %v2024_v46, %v1606_v57 }
 0x8f4   : > { %1624 = vst.msk [vmem:[#allocation2] sm:$0xff] %vm830_vm8, %v1622_v58 }
 0x8f5   : > { %v1611_v60 = vsel %vm1610_vm12, %v2024_v46, %v1607_v59 }
 0x8f6   : > { %v1613_v62 = vmul.f32 %v1611_v60, %v1579_v61 }
 0x8f8   : > { %v1618_v63 = vmul.f32 %v1977_v49, %v1613_v62  ;;  %1629 = sbr.rel (%p1902_p5) target bundleno = 2453 (0x995), region = 100 }
 0x8fa   : > { %v1623_v0 = vadd.f32 %v1978_v53, %v1618_v63 }
 0x8fc   : > { %1625 = vst.msk [vmem:[#allocation2 + $0x8] sm:$0xff] %vm830_vm8, %v1623_v0 }
 0x8fd   : > { %v1931_v1 = vld [vmem:[%s2520_s20 + $0x8] sm:$0xff]  ;;  %v1930_v7 = vld [vmem:[%s2520_s20] sm:$0xff]  ;;  %v1630_v2 = vpack.c.bf16 %v1623_v0, %v1622_v58  ;;  %vm1670_vm13 = vcmask 253952  }
 0x8fe   : > { %1660 = vmatpush.bf16.msra.mxu0 %v1931_v1  ;;  %v2025_v3 = vld [vmem:[%s2521_s24] ss:$0 sm:$0xff] }
 0x902   : > { %1661 = vmatpush.bf16.msra.mxu0 %v1930_v7 }
 0x905   : > { %1911 = vmatmul.msk.bf16.vlgmr.msra.gmra.mxu0 %vm830_vm8, %v1630_v2 }
 0x982   : > { %v1663_v4 = vpop.f32.mrf.mxu0 }
 0x983   : > { %v1664_v5 = vadd.f32 %v2025_v3, %v1663_v4 }
 0x985   : > { %2026 = vtanh.f32 %v1664_v5 }
 0x98a   : > { %v1665_v6 = vpop.f32.mrf.mxu0 }
 0x98b   : > { %v2027_v8 = vpop.eup %2026  ;;  %v1666_v9 = vadd.f32 %v2025_v3, %v1665_v6 }
 0x98c   : > { %1671 = vst.msk [vmem:[#allocation4] sm:$0x1] %vm1670_vm13, %v2027_v8 }
 0x98d   : > { %2028 = vtanh.f32 %v1666_v9 }
 0x993   : > { %v2029_v10 = vpop.eup %2028 }
 0x994   : > { %1672 = vst.msk [vmem:[#allocation4 + $0x1] sm:$0x1] %vm1670_vm13, %v2029_v10 }
 0x995 PF: > { %p1936_p6 = scmp.eq.s32.totalorder %s2188_s28, 1  ;;  %s2086_s26 = smov [#allocation4]  }
 0x996   : > { %s1679_s1 = sshll.u32 %s2086_s26, 4  ;;  %s2522_s6 = sld [smem:[#allocation16_spill]]  ;;  %s1680_s1 = int_to_ptr.vmem [resolvable:$true] %s1679_s1 }
 0x99c   : > { %s1681_s27 = sshll.u32 %s2522_s6, 4  ;;  %s1682_s27 = int_to_ptr.hbm [resolvable:$true] %s1681_s27 }
 0x99d   : > { %1933 = dma.vmem_to_hbm [thread:$0]  (%p1936_p6), %s1680_s1, 32, %s1682_s27, [#allocation5]  }
 0x99e   : > { %2063 = dma.done.wait (%p1936_p6), [#allocation5], 32  }
 0x99f   : > { %2065 = vsyncadd (%p1936_p6), [#allocation5], 4294967264 }
 0x9a0 PF: > { %s2523_s0 = sld [smem:[#allocation7_spill]] }
 0x9a6   : > { %s29_s27 = sadd.s32 1, %s2523_s0  }
 0x9a7   : > { %p26_p7 = scmp.ge.s32.totalorder %s29_s27, 4  }
 0x9a9   :  { %28 = sbr.rel (!%p26_p7) target bundleno = 10 (0xa), region = 160 }
 0x9ae   :  { %1695 = vsyncpa [#allocation5], 1 }
 0x9af   :  { %1697 = vsyncpa [#allocation5 + $0x1], 1 }

</bundles_post_ra>
